<compile_context>
chip_gen: v5e
topology: v5e:2x2
jax: 0.10.0
libtpu: 0.0.40
codegen_flags: <defaults>
</compile_context>

<pallas_src>
import numpy as np
import jax
import jax.numpy as jnp
from jax.experimental import pallas as pl
from jax.experimental.pallas import tpu as pltpu

EPS = 1e-5          # nn.LayerNorm default eps
LANE = 128          # vreg lane width; each signal slab padded to this
HEAD_PAD = 128      # lane-dense fused V|A output width
N_SIG = 6           # [close, volume, rsi, macd, cci, adx]


def _round_up(x, m):
    return ((x + m - 1) // m) * m


# --------------------------------------------------------------------------
# Pallas kernel: per batch-tile forward pass.
#   x_ref  : (6, TB, D)       f32   signal tile
#   wt_ref : (6*LANE, H)      bf16  fused trunk weight (LN gamma + convs + fc1)
#   bt_ref : (1, H)           f32   fused trunk bias  (LN beta + conv/fc biases)
#   wh_ref : (H, HEAD_PAD)    bf16  fused head weight [V | A | zero pad]
#   bh_ref : (1, HEAD_PAD)    f32   fused head bias
#   out_ref: (TB, HEAD_PAD)   f32   col 0 = V, cols 1..n_actions = A
# --------------------------------------------------------------------------
def _dueling_kernel(x_ref, wt_ref, bt_ref, wh_ref, bh_ref, out_ref):
    x = x_ref[...]                                          # (6, TB, D) f32
    mu = jnp.mean(x, axis=-1, keepdims=True)
    var = jnp.mean(jnp.square(x - mu), axis=-1, keepdims=True)
    # LN affine is folded into wt/bt -> only statistics here.  The bf16 cast is
    # the last vector op (v5e has no bf16 VPU) and halves LHS relayout bytes.
    z = ((x - mu) * jax.lax.rsqrt(var + EPS)).astype(jnp.bfloat16)

    tb, d = z.shape[1], z.shape[2]
    # Lane-aligned LHS: each signal slab starts at a 128-lane vreg boundary, so
    # this concatenate is pure vreg placement (no XLU cross-lane shuffle).
    if d < LANE:
        pad = jnp.zeros((tb, LANE - d), jnp.bfloat16)
        slabs = []
        for i in range(N_SIG):
            slabs.append(z[i])
            slabs.append(pad)
    else:
        slabs = [z[i] for i in range(N_SIG)]
    lhs = jnp.concatenate(slabs, axis=-1)                   # (TB, 6*LANE) bf16

    # fused trunk: one MXU matmul with f32 accumulation
    h = jnp.dot(lhs, wt_ref[...],
                preferred_element_type=jnp.float32) + bt_ref[...]      # (TB, H)

    # fused V|A head: one matmul, one lane-dense store
    out_ref[...] = (jnp.dot(h.astype(jnp.bfloat16), wh_ref[...],
                            preferred_element_type=jnp.float32) + bh_ref[...])


# --------------------------------------------------------------------------
# Glue: Toeplitz lowering + full algebraic fusion (plain numpy, f64 compose).
# --------------------------------------------------------------------------
def _conv1_toeplitz(w, b, D):
    """Conv1d(1, Cout, K): x(D,) @ M -> flat (Cout*L,), index c*L+t."""
    w = np.asarray(w, np.float64)
    b = np.asarray(b, np.float64)
    Cout, _, K = w.shape
    L = D - K + 1
    M = np.zeros((D, Cout * L), np.float64)
    for c in range(Cout):
        for t in range(L):
            M[t:t + K, c * L + t] = w[c, 0]
    return M, np.repeat(b, L)


def _conv2_toeplitz(w, b, L1):
    """Conv1d(Cin, 1, K) on flat (Cin*L1,) input: z @ M -> (L2,)."""
    w = np.asarray(w, np.float64)
    b = np.asarray(b, np.float64)
    _, Cin, K = w.shape
    L2 = L1 - K + 1
    M = np.zeros((Cin * L1, L2), np.float64)
    for c in range(Cin):
        for s in range(L2):
            M[c * L1 + s:c * L1 + s + K, s] = w[0, c]
    return M, np.full((L2,), float(b[0]), np.float64)


def build_fused_params(p, D, n_actions):
    """Fold LN affine + conv1 + conv2 + fc1 into one lane-padded (6*128, H)
    trunk weight / bias, and fold V|A into one lane-padded (H, 128) head."""
    assert D <= LANE and 1 + n_actions <= HEAD_PAD
    L1 = D - 9
    f64 = lambda a: np.asarray(a, np.float64)

    M1p, b1p = _conv1_toeplitz(p['w_conv1_price'], p['b_conv1_price'], D)
    M2p, b2p = _conv2_toeplitz(p['w_conv2_price'], p['b_conv2_price'], L1)
    M1m, b1m = _conv1_toeplitz(p['w_conv1_macd'], p['b_conv1_macd'], D)
    M2m, b2m = _conv2_toeplitz(p['w_conv2_macd'], p['b_conv2_macd'], L1)
    M1a, b1a = _conv1_toeplitz(p['w_conv1_adx'], p['b_conv1_adx'], D)
    M2a, b2a = _conv2_toeplitz(p['w_conv2_adx'], p['b_conv2_adx'], L1)

    # composed conv stages (shared-weight branches: conv1 bias counted twice,
    # exactly as when two biased conv outputs are summed in the reference)
    Cp, cbp = M1p @ M2p, b1p @ M2p + b2p                    # (D, L2), (L2,)
    Cm, cbm = M1m @ M2m, 2.0 * (b1m @ M2m) + b2m
    Ca, cba = M1a @ M2a, 2.0 * (b1a @ M2a) + b2a

    wp = f64(p['w_fc_price']).T                             # (L2, H)
    wv = f64(p['w_fc_volume']).T                            # (D,  H)
    wf = f64(p['w_fc_features']).T                          # (L2, H)
    H = wp.shape[1]

    # per-signal composed (D, H) blocks: [price, volume, rsi, macd, cci, adx]
    Wrm = Cm @ wf
    Wca = Ca @ wf
    blocks = [Cp @ wp, wv, Wrm, Wrm, Wca, Wca]

    gamma = f64(p['ln_gamma'])                              # (6, D)
    beta = f64(p['ln_beta'])                                # (6, D)

    b_trunk = (cbp @ wp + f64(p['b_fc_price']) + f64(p['b_fc_volume'])
               + (cbm + cba) @ wf + f64(p['b_fc_features']))            # (H,)
    W_trunk = np.zeros((N_SIG * LANE, H), np.float64)
    for i, Wb in enumerate(blocks):
        # fold gamma into the weight rows (zero rows pad each slab to 128 lanes)
        W_trunk[i * LANE:i * LANE + D, :] = gamma[i][:, None] * Wb
        # fold beta into the bias
        b_trunk = b_trunk + beta[i] @ Wb

    W_head = np.zeros((H, HEAD_PAD), np.float64)
    W_head[:, 0:1] = f64(p['w_V']).T
    W_head[:, 1:1 + n_actions] = f64(p['w_A']).T
    b_head = np.zeros((HEAD_PAD,), np.float64)
    b_head[0] = float(np.asarray(p['b_V'])[0])
    b_head[1:1 + n_actions] = f64(p['b_A'])

    return (jnp.asarray(W_trunk, jnp.bfloat16),
            jnp.asarray(b_trunk[None, :], jnp.float32),
            jnp.asarray(W_head, jnp.bfloat16),
            jnp.asarray(b_head[None, :], jnp.float32))


# --------------------------------------------------------------------------
# Wrapper around pallas_call.
# --------------------------------------------------------------------------
def dueling_forward_pallas(X, p, buy_count, n_buys, n_actions, block_b=None):
    _, B, D = X.shape
    assert D <= LANE

    if block_b is None:
        # 256 fills the MXU M dim on v6e/v7x (pass block_b=128 on v5e);
        # clamped so tiny per-env-step batches are not padded all the way up.
        block_b = 256
    TB = max(16, min(_round_up(block_b, 16), _round_up(B, 16)))  # multiple of 16 (bf16 packing)
    Bp = _round_up(B, TB)
    grid = (Bp // TB,)

    W_trunk, b_trunk, W_head, b_head = build_fused_params(p, D, n_actions)

    Xp = jnp.zeros((N_SIG, Bp, D), jnp.float32).at[:, :B, :].set(X.astype(jnp.float32))

    out = pl.pallas_call(
        _dueling_kernel,
        out_shape=jax.ShapeDtypeStruct((Bp, HEAD_PAD), jnp.float32),
        grid_spec=pltpu.PrefetchScalarGridSpec(
            num_scalar_prefetch=0,
            grid=grid,
            in_specs=[
                pl.BlockSpec((N_SIG, TB, D), lambda i: (0, i, 0)),    # batch tile
                pl.BlockSpec(tuple(W_trunk.shape), lambda i: (0, 0)), # VMEM-resident
                pl.BlockSpec(tuple(b_trunk.shape), lambda i: (0, 0)),
                pl.BlockSpec(tuple(W_head.shape), lambda i: (0, 0)),
                pl.BlockSpec(tuple(b_head.shape), lambda i: (0, 0)),
            ],
            out_specs=pl.BlockSpec((TB, HEAD_PAD), lambda i: (i, 0)),
        ),
        compiler_params=pltpu.CompilerParams(
            dimension_semantics=("parallel",)),     # shard batch blocks over v7x TCs
    )(Xp, W_trunk, b_trunk, W_head, b_head)

    V = out[:B, 0:1]
    A = out[:B, 1:1 + n_actions]

    # buy_count-dependent advantage masking, lifted out of the kernel
    # (mirrors the module's Python-level if/elif on state['buy_count'][-1]).
    if buy_count == 0:
        A = A.at[:, 2].set(jnp.min(A))
    elif buy_count >= n_buys:
        A = A.at[:, 0].set(jnp.min(A))
    return V, A


# --------------------------------------------------------------------------
# Deterministic parameter init (shapes per the module __init__).
# --------------------------------------------------------------------------
def init_params(key, D, n_actions):
    ks = iter(jax.random.split(key, 24))

    def rn(shape, scale=0.1):
        return (scale * jax.random.normal(next(ks), shape)).astype(jnp.float32)

    p = {}
    p['ln_gamma'] = (1.0 + rn((6, D), 0.05)).astype(jnp.float32)
    p['ln_beta'] = rn((6, D), 0.05)
    for name in ('price', 'macd', 'adx'):
        p[f'w_conv1_{name}'] = rn((8, 1, 10))
        p[f'b_conv1_{name}'] = rn((8,))
        p[f'w_conv2_{name}'] = rn((1, 8, 10))
        p[f'b_conv2_{name}'] = rn((1,))
    p['w_fc_price'] = rn((512, D - 18))
    p['b_fc_price'] = rn((512,))
    p['w_fc_volume'] = rn((512, D))
    p['b_fc_volume'] = rn((512,))
    p['w_fc_features'] = rn((512, D - 18))
    p['b_fc_features'] = rn((512,))
    p['w_V'] = rn((1, 512))
    p['b_V'] = rn((1,))
    p['w_A'] = rn((n_actions, 512))
    p['b_A'] = rn((n_actions,))
    return p


# --------------------------------------------------------------------------
# Pure-JAX reference (mirrors the PyTorch forward, NCL convs, f32 HIGHEST).
# --------------------------------------------------------------------------
def reference_forward(X, p, buy_count, n_buys):
    prec = jax.lax.Precision.HIGHEST

    def ln(v, i):
        mu = jnp.mean(v, axis=-1, keepdims=True)
        var = jnp.mean((v - mu) ** 2, axis=-1, keepdims=True)
        return (v - mu) / jnp.sqrt(var + EPS) * p['ln_gamma'][i] + p['ln_beta'][i]

    def conv(v, w, b):  # v: (B, Cin, L)
        out = jax.lax.conv_general_dilated(
            v, w, (1,), 'VALID',
            dimension_numbers=('NCH', 'OIH', 'NCH'), precision=prec)
        return out + b[None, :, None]

    price_n, vol_n = ln(X[0], 0), ln(X[1], 1)
    rsi_n, macd_n = ln(X[2], 2), ln(X[3], 3)
    cci_n, adx_n = ln(X[4], 4), ln(X[5], 5)

    pc = conv(price_n[:, None, :], p['w_conv1_price'], p['b_conv1_price'])
    pf = conv(pc, p['w_conv2_price'], p['b_conv2_price'])[:, 0, :]

    rc = conv(rsi_n[:, None, :], p['w_conv1_macd'], p['b_conv1_macd'])
    mc = conv(macd_n[:, None, :], p['w_conv1_macd'], p['b_conv1_macd'])
    rmf = conv(rc + mc, p['w_conv2_macd'], p['b_conv2_macd'])[:, 0, :]

    cc = conv(cci_n[:, None, :], p['w_conv1_adx'], p['b_conv1_adx'])
    ac = conv(adx_n[:, None, :], p['w_conv1_adx'], p['b_conv1_adx'])
    caf = conv(cc + ac, p['w_conv2_adx'], p['b_conv2_adx'])[:, 0, :]

    conv_last = caf + rmf

    h = (jnp.dot(pf, p['w_fc_price'].T, precision=prec) + p['b_fc_price']
         + jnp.dot(vol_n, p['w_fc_volume'].T, precision=prec) + p['b_fc_volume']
         + jnp.dot(conv_last, p['w_fc_features'].T, precision=prec) + p['b_fc_features'])
    V = jnp.dot(h, p['w_V'].T, precision=prec) + p['b_V']
    A = jnp.dot(h, p['w_A'].T, precision=prec) + p['b_A']

    if buy_count == 0:
        A = A.at[:, 2].set(jnp.min(A))
    elif buy_count >= n_buys:
        A = A.at[:, 0].set(jnp.min(A))
    return V, A


if __name__ == "__main__":
    B, D, n_actions, n_buys = 2, 64, 3, 4   # input_dim=64 -> conv outputs 55, 46

    key = jax.random.PRNGKey(0)
    kx, kp = jax.random.split(key)
    X = jax.random.normal(kx, (6, B, D), dtype=jnp.float32)  # [close,vol,rsi,macd,cci,adx]
    params = init_params(kp, D, n_actions)

    ok = True
    for buy_count in (0, 2, 4):   # exercise all three masking branches
        V, A = dueling_forward_pallas(X, params, buy_count, n_buys, n_actions)
        jax.block_until_ready((V, A))
        V_ref, A_ref = reference_forward(X, params, buy_count, n_buys)
        # tolerance accounts for the bf16 MXU path (f32 accumulation)
        ok &= np.allclose(np.asarray(V), np.asarray(V_ref), rtol=2e-2, atol=5e-2)
        ok &= np.allclose(np.asarray(A), np.asarray(A_ref), rtol=2e-2, atol=5e-2)

    if ok:
        print("KERNEL_OK")
</pallas_src>

<mosaic_0001>
module attributes {stable_mosaic.version = 11 : i64} {
  func.func @_dueling_kernel(%arg0: i32, %arg1: memref<6x16x64xf32, #tpu.memory_space<vmem>>, %arg2: memref<768x512xbf16, #tpu.memory_space<vmem>>, %arg3: memref<1x512xf32, #tpu.memory_space<vmem>>, %arg4: memref<512x128xbf16, #tpu.memory_space<vmem>>, %arg5: memref<1x128xf32, #tpu.memory_space<vmem>>, %arg6: memref<16x128xf32, #tpu.memory_space<vmem>>) attributes {dimension_semantics = [#tpu.dimension_semantics<parallel>], iteration_bounds = array<i64: 1>, scalar_prefetch = 0 : i64, scratch_operands = 0 : i64, tpu.core_type = #tpu.core_type<tc>, window_params = [{transform_indices = @transform_0, window_bounds = array<i64: 6, 16, 64>}, {pipeline_mode = #tpu.pipeline_mode<synchronous>, transform_indices = @transform_1, window_bounds = array<i64: 768, 512>}, {pipeline_mode = #tpu.pipeline_mode<synchronous>, transform_indices = @transform_2, window_bounds = array<i64: 1, 512>}, {pipeline_mode = #tpu.pipeline_mode<synchronous>, transform_indices = @transform_3, window_bounds = array<i64: 512, 128>}, {pipeline_mode = #tpu.pipeline_mode<synchronous>, transform_indices = @transform_4, window_bounds = array<i64: 1, 128>}, {transform_indices = @transform_5, window_bounds = array<i64: 16, 128>}]} {
    %c0 = arith.constant 0 : index
    %c0_0 = arith.constant 0 : index
    %c0_1 = arith.constant 0 : index
    %0 = vector.load %arg1[%c0, %c0_0, %c0_1] : memref<6x16x64xf32, #tpu.memory_space<vmem>>, vector<6x16x64xf32>
    %cst = arith.constant dense<0.000000e+00> : vector<6x16xf32>
    %1 = vector.multi_reduction <add>, %0, %cst [2] : vector<6x16x64xf32> to vector<6x16xf32>
    %2 = vector.shape_cast %1 : vector<6x16xf32> to vector<6x16x1xf32>
    %cst_2 = arith.constant 6.400000e+01 : f32
    %3 = vector.broadcast %cst_2 : f32 to vector<6x16x1xf32>
    %4 = arith.divf %2, %3 : vector<6x16x1xf32>
    %5 = vector.broadcast %4 : vector<6x16x1xf32> to vector<6x16x64xf32>
    %6 = arith.subf %0, %5 : vector<6x16x64xf32>
    %7 = arith.mulf %6, %6 : vector<6x16x64xf32>
    %cst_3 = arith.constant dense<0.000000e+00> : vector<6x16xf32>
    %8 = vector.multi_reduction <add>, %7, %cst_3 [2] : vector<6x16x64xf32> to vector<6x16xf32>
    %9 = vector.shape_cast %8 : vector<6x16xf32> to vector<6x16x1xf32>
    %cst_4 = arith.constant 6.400000e+01 : f32
    %10 = vector.broadcast %cst_4 : f32 to vector<6x16x1xf32>
    %11 = arith.divf %9, %10 : vector<6x16x1xf32>
    %12 = vector.broadcast %4 : vector<6x16x1xf32> to vector<6x16x64xf32>
    %13 = arith.subf %0, %12 : vector<6x16x64xf32>
    %cst_5 = arith.constant 9.99999974E-6 : f32
    %14 = vector.broadcast %cst_5 : f32 to vector<6x16x1xf32>
    %15 = arith.addf %11, %14 : vector<6x16x1xf32>
    %16 = math.rsqrt %15 : vector<6x16x1xf32>
    %17 = vector.broadcast %16 : vector<6x16x1xf32> to vector<6x16x64xf32>
    %18 = arith.mulf %13, %17 : vector<6x16x64xf32>
    %19 = arith.truncf %18 : vector<6x16x64xf32> to vector<6x16x64xbf16>
    %cst_6 = arith.constant 0.000000e+00 : bf16
    %20 = vector.broadcast %cst_6 : bf16 to vector<16x64xbf16>
    %21 = vector.extract_strided_slice %19 {offsets = [0, 0, 0], sizes = [1, 16, 64], strides = [1, 1, 1]} : vector<6x16x64xbf16> to vector<1x16x64xbf16>
    %22 = vector.shape_cast %21 : vector<1x16x64xbf16> to vector<16x64xbf16>
    %23 = vector.extract_strided_slice %19 {offsets = [1, 0, 0], sizes = [1, 16, 64], strides = [1, 1, 1]} : vector<6x16x64xbf16> to vector<1x16x64xbf16>
    %24 = vector.shape_cast %23 : vector<1x16x64xbf16> to vector<16x64xbf16>
    %25 = vector.extract_strided_slice %19 {offsets = [2, 0, 0], sizes = [1, 16, 64], strides = [1, 1, 1]} : vector<6x16x64xbf16> to vector<1x16x64xbf16>
    %26 = vector.shape_cast %25 : vector<1x16x64xbf16> to vector<16x64xbf16>
    %27 = vector.extract_strided_slice %19 {offsets = [3, 0, 0], sizes = [1, 16, 64], strides = [1, 1, 1]} : vector<6x16x64xbf16> to vector<1x16x64xbf16>
    %28 = vector.shape_cast %27 : vector<1x16x64xbf16> to vector<16x64xbf16>
    %29 = vector.extract_strided_slice %19 {offsets = [4, 0, 0], sizes = [1, 16, 64], strides = [1, 1, 1]} : vector<6x16x64xbf16> to vector<1x16x64xbf16>
    %30 = vector.shape_cast %29 : vector<1x16x64xbf16> to vector<16x64xbf16>
    %31 = vector.extract_strided_slice %19 {offsets = [5, 0, 0], sizes = [1, 16, 64], strides = [1, 1, 1]} : vector<6x16x64xbf16> to vector<1x16x64xbf16>
    %32 = vector.shape_cast %31 : vector<1x16x64xbf16> to vector<16x64xbf16>
    %33 = tpu.concatenate %22, %20, %24, %20, %26, %20, %28, %20, %30, %20, %32, %20 in 1 : vector<16x64xbf16>, vector<16x64xbf16>, vector<16x64xbf16>, vector<16x64xbf16>, vector<16x64xbf16>, vector<16x64xbf16>, vector<16x64xbf16>, vector<16x64xbf16>, vector<16x64xbf16>, vector<16x64xbf16>, vector<16x64xbf16>, vector<16x64xbf16> -> vector<16x768xbf16>
    %c0_7 = arith.constant 0 : index
    %c0_8 = arith.constant 0 : index
    %34 = vector.load %arg2[%c0_7, %c0_8] : memref<768x512xbf16, #tpu.memory_space<vmem>>, vector<768x512xbf16>
    %cst_9 = arith.constant dense<0.000000e+00> : vector<16x512xf32>
    %35 = tpu.matmul %33, %34, %cst_9 {dimension_numbers = #tpu.dot_dimension_numbers<[1], [0], [0], [1], [0, 0, 1, 1], [], []>} : vector<16x768xbf16>, vector<768x512xbf16>, vector<16x512xf32> -> vector<16x512xf32>
    %c0_10 = arith.constant 0 : index
    %c0_11 = arith.constant 0 : index
    %36 = vector.load %arg3[%c0_10, %c0_11] : memref<1x512xf32, #tpu.memory_space<vmem>>, vector<1x512xf32>
    %37 = vector.broadcast %36 : vector<1x512xf32> to vector<16x512xf32>
    %38 = arith.addf %35, %37 : vector<16x512xf32>
    %39 = arith.truncf %38 : vector<16x512xf32> to vector<16x512xbf16>
    %c0_12 = arith.constant 0 : index
    %c0_13 = arith.constant 0 : index
    %40 = vector.load %arg4[%c0_12, %c0_13] : memref<512x128xbf16, #tpu.memory_space<vmem>>, vector<512x128xbf16>
    %cst_14 = arith.constant dense<0.000000e+00> : vector<16x128xf32>
    %41 = tpu.matmul %39, %40, %cst_14 {dimension_numbers = #tpu.dot_dimension_numbers<[1], [0], [0], [1], [0, 0, 1, 1], [], []>} : vector<16x512xbf16>, vector<512x128xbf16>, vector<16x128xf32> -> vector<16x128xf32>
    %c0_15 = arith.constant 0 : index
    %c0_16 = arith.constant 0 : index
    %42 = vector.load %arg5[%c0_15, %c0_16] : memref<1x128xf32, #tpu.memory_space<vmem>>, vector<1x128xf32>
    %43 = vector.broadcast %42 : vector<1x128xf32> to vector<16x128xf32>
    %44 = arith.addf %41, %43 : vector<16x128xf32>
    %c0_17 = arith.constant 0 : index
    %c0_18 = arith.constant 0 : index
    %45 = vector.load %arg6[%c0_17, %c0_18] : memref<16x128xf32, #tpu.memory_space<vmem>>, vector<16x128xf32>
    tpu.vector_store %arg6[%c0_17, %c0_18], %44 {strides = array<i32>} : memref<16x128xf32, #tpu.memory_space<vmem>>, vector<16x128xf32>,
    return
  }
  func.func @transform_0(%arg0: i32) -> (i32, i32, i32) {
    %c0_i32 = arith.constant 0 : i32
    %c0_i32_0 = arith.constant 0 : i32
    %c0_i32_1 = arith.constant 0 : i32
    return %c0_i32, %arg0, %c0_i32_0 : i32, i32, i32
  }
  func.func @transform_1(%arg0: i32) -> (i32, i32) {
    %c0_i32 = arith.constant 0 : i32
    %c0_i32_0 = arith.constant 0 : i32
    %c0_i32_1 = arith.constant 0 : i32
    return %c0_i32, %c0_i32_0 : i32, i32
  }
  func.func @transform_2(%arg0: i32) -> (i32, i32) {
    %c0_i32 = arith.constant 0 : i32
    %c0_i32_0 = arith.constant 0 : i32
    %c0_i32_1 = arith.constant 0 : i32
    return %c0_i32, %c0_i32_0 : i32, i32
  }
  func.func @transform_3(%arg0: i32) -> (i32, i32) {
    %c0_i32 = arith.constant 0 : i32
    %c0_i32_0 = arith.constant 0 : i32
    %c0_i32_1 = arith.constant 0 : i32
    return %c0_i32, %c0_i32_0 : i32, i32
  }
  func.func @transform_4(%arg0: i32) -> (i32, i32) {
    %c0_i32 = arith.constant 0 : i32
    %c0_i32_0 = arith.constant 0 : i32
    %c0_i32_1 = arith.constant 0 : i32
    return %c0_i32, %c0_i32_0 : i32, i32
  }
  func.func @transform_5(%arg0: i32) -> (i32, i32) {
    %c0_i32 = arith.constant 0 : i32
    %c0_i32_0 = arith.constant 0 : i32
    return %arg0, %c0_i32 : i32, i32
  }
}

</mosaic_0001>

<bundles_post_ra>
// kernel: tpu_custom_call.1
= control target key start
LH: loop header
LB: loop body
LE: loop exit
PB: predicated region body
PF: predicated region fallthrough
CT: control target
= control target key end

     0   :  { %10 = vsyncpa [#allocation3], 0  ;;  %s4143_s0 = inlined_call_operand.hbm [shape: f32[6,16,64], index: 0, kind: input, shape index: {}]   ;;  %s4144_s1 = inlined_call_operand.hbm [shape: bf16[768,512], index: 1, kind: input, shape index: {}]   ;;  %s4145_s2 = inlined_call_operand.hbm [shape: f32[1,512], index: 2, kind: input, shape index: {}]   ;;  %s4146_s3 = inlined_call_operand.hbm [shape: bf16[512,128], index: 3, kind: input, shape index: {}]   ;;  %s4147_s4 = inlined_call_operand.vmem [shape: f32[1,128], index: 4, kind: input, shape index: {}]   ;;  %s4148_s5 = inlined_call_operand.hbm [shape: f32[16,128], index: 5, kind: output, shape index: {}]  }
   0x1   :  { %11 = vsyncpa [#allocation6], 0 }
   0x2   :  { %12 = vsyncpa [#allocation9], 0  ;;  %s31_s20 = sshll.u32 %s4144_s1, 4  ;;  %s32_s20 = int_to_ptr.hbm [resolvable:$true] %s31_s20 }
   0x3   :  { %13 = vsyncpa [#allocation4], 0  ;;  %s3580_s21 = smov [#allocation5]   ;;  %s18_s25 = sshll.u32 %s4143_s0, 4  ;;  %s19_s25 = int_to_ptr.hbm [resolvable:$true] %s18_s25 }
   0x4   :  { %s33_s22 = sshll.u32 %s3580_s21, 4  ;;  %s3581_s26 = smov 256   ;;  %s34_s22 = int_to_ptr.vmem [resolvable:$true] %s33_s22 }
   0x5   :  { %s3582_s27 = smov 16   ;;  %s3583_s28 = smov [#allocation2]  }
   0x6   :  { %39 = dma.hbm_to_vmem [thread:$0]  %s32_s20, 24576, %s34_s22, [#allocation6], %s3581_s26, %s3581_s26, %s3582_s27  }
   0x7   :  { %s20_s29 = sshll.u32 %s3583_s28, 4  ;;  %s3584_s30 = smov 128   ;;  %s21_s29 = int_to_ptr.vmem [resolvable:$true] %s20_s29 }
   0x8   :  { %s3585_s6 = smov 8   ;;  %s45_s8 = sshll.u32 %s4145_s2, 4  ;;  %s46_s8 = int_to_ptr.hbm [resolvable:$true] %s45_s8 }
   0x9   :  { %26 = dma.hbm_to_vmem [thread:$0]  %s19_s25, 1536, %s21_s29, [#allocation3], %s3584_s30, %s3584_s30, %s3585_s6  }
   0xa   :  { %s3586_s9 = smov [#allocation7]   ;;  %s55_s12 = sshll.u32 %s4146_s3, 4  ;;  %s56_s12 = int_to_ptr.hbm [resolvable:$true] %s55_s12 }
   0xb   :  { %s47_s0 = sshll.u32 %s3586_s9, 4  ;;  %s3587_s13 = smov [#allocation8]   ;;  %s48_s0 = int_to_ptr.vmem [resolvable:$true] %s47_s0 }
   0xc   :  { %50 = dma.hbm_to_vmem [thread:$0]  %s46_s8, 64, %s48_s0, [#allocation6]  }
   0xd   :  { %s57_s14 = sshll.u32 %s3587_s13, 4  ;;  %s3588_s15 = smov 64   ;;  %s58_s14 = int_to_ptr.vmem [resolvable:$true] %s57_s14 }
   0xe   :  { %s3589_s16 = smov 4  }
   0xf   :  { %63 = dma.hbm_to_vmem [thread:$0]  %s56_s12, 4096, %s58_s14, [#allocation9], %s3588_s15, %s3588_s15, %s3589_s16  }
  0x10   :  { %3572 = dma.done.wait [#allocation3], 1536  }
  0x11   :  { %3573 = vsyncadd [#allocation3], 4294965760 }
  0x12   :  { %3574 = dma.done.wait [#allocation6], 24640  }
  0x13   :  { %3575 = vsyncadd [#allocation6], 4294942656 }
  0x14   :  { %3576 = dma.done.wait [#allocation9], 4096  }
  0x15   :  { %3577 = vsyncadd [#allocation9], 4294963200  ;;  %vm95_vm0 = vcmask 523264   ;;  %v3637_v0 = vld [vmem:[#allocation2 + $0x30] sm:$0xff]  ;;  %v87_v1 = vld [vmem:[#allocation2 + $0x20] sm:$0xff]  ;;  %v3590_v24 = vmov 64.0  }
  0x16   :  { %v83_v2 = vld [vmem:[#allocation2] sm:$0xff]  ;;  %v114_v3 = vsel %vm95_vm0, %v3637_v0, 0.0  ;;  %v108_v4 = vsel %vm95_vm0, %v87_v1, 0.0  ;;  %v3643_v6 = vld [vmem:[#allocation2 + $0x38] sm:$0xff]  ;;  %v3645_v7 = vld [vmem:[#allocation2 + $0x28] sm:$0xff]  ;;  %3426 = vrcp.f32 %v3590_v24  ;;  %s3591_s17 = smov [#allocation10]  }
  0x17   :  { %v96_v5 = vsel %vm95_vm0, %v83_v2, 0.0  ;;  %115 = vadd.xlane.f32.xlu2 %v114_v3  ;;  %109 = vadd.xlane.f32.xlu0 %v108_v4  ;;  %v3647_v8 = vld [vmem:[#allocation2 + $0x8] sm:$0xff]  ;;  %v117_v9 = vsel %vm95_vm0, %v3643_v6, 0.0  ;;  %v111_v10 = vsel %vm95_vm0, %v3645_v7, 0.0  ;;  %v3655_v12 = vld [vmem:[#allocation2 + $0x40] sm:$0xff]  ;;  %v3657_v13 = vld [vmem:[#allocation2 + $0x10] sm:$0xff] }
  0x18   :  { %97 = vadd.xlane.f32.xlu1 %v96_v5  ;;  %v99_v11 = vsel %vm95_vm0, %v3647_v8, 0.0  ;;  %v3659_v14 = vld [vmem:[#allocation2 + $0x18] sm:$0xff]  ;;  %v120_v15 = vsel %vm95_vm0, %v3655_v12, 0.0  ;;  %v102_v16 = vsel %vm95_vm0, %v3657_v13, 0.0  ;;  %v3669_v19 = vld [vmem:[#allocation2 + $0x48] sm:$0xff]  ;;  %v3671_v20 = vld [vmem:[#allocation2 + $0x50] sm:$0xff] }
  0x19   :  { %v105_v17 = vsel %vm95_vm0, %v3659_v14, 0.0  ;;  %v3667_v18 = vld [vmem:[#allocation2 + $0x58] sm:$0xff]  ;;  %v123_v22 = vsel %vm95_vm0, %v3669_v19, 0.0  ;;  %v126_v23 = vsel %vm95_vm0, %v3671_v20, 0.0  ;;  %v2383_v44 = vld [vmem:[#allocation5 + $0xe0] sm:$0xf] }
  0x1a   :  { %v129_v21 = vsel %vm95_vm0, %v3667_v18, 0.0  ;;  %v3219_v45 = vld [vmem:[#allocation5 + $0xec] sm:$0xf0]  ;;  %v2639_v50 = vld [vmem:[#allocation5 + $0x2e0] sm:$0xf]  ;;  %s2252_s18 = sshll.u32 %s3591_s17, 4  ;;  %s2253_s18 = int_to_ptr.vmem [resolvable:$true] %s2252_s18 }
  0x1b   :  { %v2384_v49 = vor.u32 %v3219_v45, %v2383_v44  ;;  %v3283_v51 = vld [vmem:[#allocation5 + $0x2ec] sm:$0xf0]  ;;  %v2367_v52 = vld [vmem:[#allocation5 + $0xc0] sm:$0xf]  ;;  %s2254_s21 = sshll.u32 %s4148_s5, 4  ;;  %s2255_s21 = int_to_ptr.hbm [resolvable:$true] %s2254_s21 }
  0x1c   :  { %v3427_v25 = vpop.eup %3426  ;;  %v2640_v55 = vor.u32 %v3283_v51, %v2639_v50  ;;  %v3215_v56 = vld [vmem:[#allocation5 + $0xcc] sm:$0xf0]  ;;  %v2623_v57 = vld [vmem:[#allocation5 + $0x2c0] sm:$0xf] }
  0x1d   :  { %v133_v26 = vmul.f32 64.0, %v3427_v25  ;;  %vm137_vm1 = vweird.f32 %v3427_v25  ;;  %v3279_v58 = vld [vmem:[#allocation5 + $0x2cc] sm:$0xf0]  ;;  %1590 = vmatpush.bf16.msra.mxu0 %v2384_v49  ;;  %v2368_v61 = vor.u32 %v3215_v56, %v2367_v52  ;;  %v2351_v62 = vld [vmem:[#allocation5 + $0xa0] sm:$0xf] }
  0x1e   :  { %1618 = vmatpush.bf16.msra.mxu2 %v2640_v55  ;;  %v2767_v3 = vld [vmem:[#allocation5 + $0x3e0] sm:$0xf]  ;;  %v3315_v4 = vld [vmem:[#allocation5 + $0x3ec] sm:$0xf0] }
  0x1f   :  { %118 = vadd.xlane.f32.xlu2 %v117_v9  ;;  %112 = vadd.xlane.f32.xlu0 %v111_v10  ;;  %v134_v27 = vsub.f32 1.0, %v133_v26  ;;  %v2607_v9 = vld [vmem:[#allocation5 + $0x2a0] sm:$0xf]  ;;  %v2768_v10 = vor.u32 %v3315_v4, %v2767_v3  ;;  %v3207_v24 = vld [vmem:[#allocation5 + $0x8c] sm:$0xf0] }
  0x20   :  { %100 = vadd.xlane.f32.xlu1 %v99_v11  ;;  %v3307_v44 = vld [vmem:[#allocation5 + $0x3ac] sm:$0xf0]  ;;  %v2319_v49 = vld [vmem:[#allocation5 + $0x60] sm:$0xf] }
  0x21   :  { %v135_v28 = vmul.f32 %v3427_v25, %v134_v27  ;;  %1591 = vmatpush.bf16.msra.mxu0 %v2368_v61  ;;  %1632 = vmatpush.bf16.msra.mxu3 %v2768_v10  ;;  %v3203_v50 = vld [vmem:[#allocation5 + $0x6c] sm:$0xf0] }
  0x23   :  { %v136_v29 = vadd.f32 %v3427_v25, %v135_v28 }
  0x25   :  { %v3679_v30 = vsel %vm137_vm1, %v3427_v25, %v136_v29  ;;  %v2511_v29 = vld [vmem:[#allocation5 + $0x1e0] sm:$0xf] }
  0x27   :  { %121 = vadd.xlane.f32.xlu2 %v120_v15  ;;  %103 = vadd.xlane.f32.xlu0 %v102_v16  ;;  %v2751_v15 = vld [vmem:[#allocation5 + $0x3c0] sm:$0xf]  ;;  %v3311_v16 = vld [vmem:[#allocation5 + $0x3cc] sm:$0xf0] }
  0x28   :  { %106 = vadd.xlane.f32.xlu1 %v105_v17  ;;  %v2752_v25 = vor.u32 %v3311_v16, %v2751_v15 }
  0x2a   :  { %1633 = vmatpush.bf16.msra.mxu3 %v2752_v25  ;;  %v3263_v25 = vld [vmem:[#allocation5 + $0x24c] sm:$0xf0] }
  0x2f   :  { %130 = vadd.xlane.f32.xlu2 %v129_v21  ;;  %124 = vadd.xlane.f32.xlu0 %v123_v22 }
  0x30   :  { %127 = vadd.xlane.f32.xlu1 %v126_v23  ;;  %v2335_v23 = vld [vmem:[#allocation5 + $0x80] sm:$0xf] }
  0x8a   :  { %v116_v31 = vpop.xlane.xlu2 %115  ;;  %v110_v32 = vpop.xlane.xlu0 %109 }
  0x8b   :  { %v143_v33 = vmul.f32 %v3679_v30, %v110_v32  ;;  %v98_v34 = vpop.xlane.xlu1 %97  ;;  %v145_v53 = vmul.f32 %v3679_v30, %v116_v31  ;;  %v3251_v31 = vld [vmem:[#allocation5 + $0x1ec] sm:$0xf0] }
  0x8c   :  { %v139_v35 = vmul.f32 %v3679_v30, %v98_v34 }
  0x8d   :  { %v3683_v36 = vsub.f32 %v87_v1, %v143_v33  ;;  %v2624_v1 = vor.u32 %v3279_v58, %v2623_v57  ;;  %v3711_v11 = vsub.f32 %v3637_v0, %v145_v53  ;;  %v2575_v53 = vld [vmem:[#allocation5 + $0x260] sm:$0xf]  ;;  %v2320_v57 = vor.u32 %v3203_v50, %v2319_v49 }
  0x8e   :  { %v3685_v37 = vsub.f32 %v83_v2, %v139_v35  ;;  %v3211_v2 = vld [vmem:[#allocation5 + $0xac] sm:$0xf0]  ;;  %v2591_v35 = vld [vmem:[#allocation5 + $0x280] sm:$0xf] }
  0x8f   :  { %v167_v38 = vmul.f32 %v3683_v36, %v3683_v36  ;;  %v2352_v22 = vor.u32 %v3211_v2, %v2351_v62  ;;  %1619 = vmatpush.bf16.msra.mxu2 %v2624_v1  ;;  %v2463_v49 = vld [vmem:[#allocation5 + $0x180] sm:$0xf] }
  0x90   :  { %v163_v39 = vmul.f32 %v3685_v37, %v3685_v37 }
  0x91   :  { %v187_v40 = vsel %vm95_vm0, %v167_v38, 0.0  ;;  %v3271_v38 = vld [vmem:[#allocation5 + $0x28c] sm:$0xf0]  ;;  %1592 = vmatpush.bf16.msra.mxu0 %v2352_v22  ;;  %v2495_v22 = vld [vmem:[#allocation5 + $0x1c0] sm:$0xf] }
  0x92   :  { %v119_v41 = vpop.xlane.xlu2 %118  ;;  %v113_v42 = vpop.xlane.xlu0 %112  ;;  %188 = vadd.xlane.f32.xlu0 %v187_v40  ;;  %v175_v43 = vsel %vm95_vm0, %v163_v39, 0.0  ;;  %v2512_v39 = vor.u32 %v3251_v31, %v2511_v29  ;;  %v2735_v40 = vld [vmem:[#allocation5 + $0x3a0] sm:$0xf] }
  0x93   :  { %v146_v46 = vmul.f32 %v3679_v30, %v119_v41  ;;  %v144_v47 = vmul.f32 %v3679_v30, %v113_v42  ;;  %176 = vadd.xlane.f32.xlu2 %v175_v43  ;;  %v101_v48 = vpop.xlane.xlu1 %100  ;;  %v169_v41 = vmul.f32 %v3711_v11, %v3711_v11  ;;  %v2336_v43 = vor.u32 %v3207_v24, %v2335_v23  ;;  %v3247_v24 = vld [vmem:[#allocation5 + $0x1cc] sm:$0xf0]  ;;  %v2287_v31 = vld [vmem:[#allocation5 + $0x20] sm:$0xf] }
  0x94   :  { %v140_v54 = vmul.f32 %v3679_v30, %v101_v48  ;;  %v2592_v48 = vor.u32 %v3271_v38, %v2591_v35  ;;  %1604 = vmatpush.bf16.msra.mxu1 %v2512_v39  ;;  %v3243_v35 = vld [vmem:[#allocation5 + $0x1ac] sm:$0xf0]  ;;  %v2543_v38 = vld [vmem:[#allocation5 + $0x220] sm:$0xf] }
  0x95   :  { %v3698_v59 = vsub.f32 %v3643_v6, %v146_v46  ;;  %v3701_v60 = vsub.f32 %v3645_v7, %v144_v47  ;;  %v3275_v7 = vld [vmem:[#allocation5 + $0x2ac] sm:$0xf0]  ;;  %v2736_v47 = vor.u32 %v3307_v44, %v2735_v40  ;;  %1593 = vmatpush.bf16.msra.mxu0 %v2336_v43 }
  0x96   :  { %v3704_v63 = vsub.f32 %v3647_v8, %v140_v54  ;;  %v2608_v28 = vor.u32 %v3275_v7, %v2607_v9  ;;  %v193_v54 = vsel %vm95_vm0, %v169_v41, 0.0  ;;  %v3259_v39 = vld [vmem:[#allocation5 + $0x22c] sm:$0xf0] }
  0x97   :  { %v168_v5 = vmul.f32 %v3701_v60, %v3701_v60  ;;  %v170_v6 = vmul.f32 %v3698_v59, %v3698_v59  ;;  %1634 = vmatpush.bf16.msra.mxu3 %v2736_v47  ;;  %v2544_v41 = vor.u32 %v3259_v39, %v2543_v38  ;;  %v3299_v43 = vld [vmem:[#allocation5 + $0x36c] sm:$0xf0]  ;;  %v2271_v47 = vld [vmem:[#allocation5] sm:$0xf] }
  0x98   :  { %v164_v8 = vmul.f32 %v3704_v63, %v3704_v63  ;;  %1620 = vmatpush.bf16.msra.mxu2 %v2608_v28  ;;  %v3303_v28 = vld [vmem:[#allocation5 + $0x38c] sm:$0xf0]  ;;  %v2415_v39 = vld [vmem:[#allocation5 + $0x120] sm:$0xf] }
  0x99   :  { %v190_v17 = vsel %vm95_vm0, %v168_v5, 0.0  ;;  %v196_v21 = vsel %vm95_vm0, %v170_v6, 0.0  ;;  %1594 = vmatpush.bf16.msra.mxu0 %v2320_v57  ;;  %v2895_v57 = vld [vmem:[#allocation5 + $0x4e0] sm:$0xf] }
  0x9a   :  { %v122_v26 = vpop.xlane.xlu2 %121  ;;  %v104_v27 = vpop.xlane.xlu0 %103  ;;  %191 = vadd.xlane.f32.xlu1 %v190_v17  ;;  %v178_v0 = vsel %vm95_vm0, %v164_v8, 0.0  ;;  %v2303_v17 = vld [vmem:[#allocation5 + $0x40] sm:$0xf] }
  0x9b   :  { %v147_v32 = vmul.f32 %v3679_v30, %v122_v26  ;;  %v141_v33 = vmul.f32 %v3679_v30, %v104_v27  ;;  %197 = vadd.xlane.f32.xlu2 %v196_v21  ;;  %179 = vadd.xlane.f32.xlu0 %v178_v0  ;;  %v107_v34 = vpop.xlane.xlu1 %106  ;;  %v3199_v21 = vld [vmem:[#allocation5 + $0x4c] sm:$0xf0]  ;;  %v2496_v26 = vor.u32 %v3247_v24, %v2495_v22  ;;  %v2719_v0 = vld [vmem:[#allocation5 + $0x380] sm:$0xf] }
  0x9c   :  { %v142_v42 = vmul.f32 %v3679_v30, %v107_v34  ;;  %1621 = vmatpush.bf16.msra.mxu2 %v2592_v48  ;;  %v2304_v23 = vor.u32 %v3199_v21, %v2303_v17  ;;  %v2720_v29 = vor.u32 %v3303_v28, %v2719_v0  ;;  %v3191_v48 = vld [vmem:[#allocation5 + $0xc] sm:$0xf0]  ;;  %v3213_v17 = vld [vmem:[#allocation5 + $0xc4] sm:$0xf]  ;;  %v2369_v21 = vld [vmem:[#allocation5 + $0xd0] sm:$0xf0] }
  0x9d   :  { %v3724_v45 = vsub.f32 %v3655_v12, %v147_v32  ;;  %v3727_v46 = vsub.f32 %v3657_v13, %v141_v33  ;;  %v3267_v13 = vld [vmem:[#allocation5 + $0x26c] sm:$0xf0]  ;;  %1605 = vmatpush.bf16.msra.mxu1 %v2496_v26  ;;  %v2479_v33 = vld [vmem:[#allocation5 + $0x1a0] sm:$0xf]  ;;  %v2272_v50 = vor.u32 %v3191_v48, %v2271_v47  ;;  %v2372_v22 = vor.u32 %v3213_v17, %v2369_v21  ;;  %v2337_v48 = vld [vmem:[#allocation5 + $0x90] sm:$0xf0] }
  0x9e   :  { %v3734_v12 = vsub.f32 %v3659_v14, %v142_v42  ;;  %v2576_v62 = vor.u32 %v3267_v13, %v2575_v53  ;;  %1595 = vmatpush.bf16.msra.mxu0 %v2304_v23  ;;  %v3195_v32 = vld [vmem:[#allocation5 + $0x2c] sm:$0xf0]  ;;  %1635 = vmatpush.bf16.msra.mxu3 %v2720_v29  ;;  %v2480_v40 = vor.u32 %v3243_v35, %v2479_v33  ;;  %v2703_v42 = vld [vmem:[#allocation5 + $0x360] sm:$0xf]  ;;  %v3249_v33 = vld [vmem:[#allocation5 + $0x1e4] sm:$0xf] }
  0x9f   :  { %v171_v51 = vmul.f32 %v3724_v45, %v3724_v45  ;;  %v165_v52 = vmul.f32 %v3727_v46, %v3727_v46  ;;  %v2288_v34 = vor.u32 %v3195_v32, %v2287_v31  ;;  %v2704_v44 = vor.u32 %v3299_v43, %v2703_v42  ;;  %v3255_v53 = vld [vmem:[#allocation5 + $0x20c] sm:$0xf0]  ;;  %v2431_v23 = vld [vmem:[#allocation5 + $0x140] sm:$0xf]  ;;  %v3209_v31 = vld [vmem:[#allocation5 + $0xa4] sm:$0xf] }
  0xa0   :  { %v166_v2 = vmul.f32 %v3734_v12, %v3734_v12  ;;  %1622 = vmatpush.bf16.msra.mxu2 %v2576_v62  ;;  %v3217_v62 = vld [vmem:[#allocation5 + $0xe4] sm:$0xf]  ;;  %v3231_v24 = vld [vmem:[#allocation5 + $0x14c] sm:$0xf0]  ;;  %v2353_v32 = vld [vmem:[#allocation5 + $0xb0] sm:$0xf0] }
  0xa1   :  { %v199_v55 = vsel %vm95_vm0, %v171_v51, 0.0  ;;  %v181_v56 = vsel %vm95_vm0, %v165_v52, 0.0  ;;  %1606 = vmatpush.bf16.msra.mxu1 %v2480_v40  ;;  %v3239_v51 = vld [vmem:[#allocation5 + $0x18c] sm:$0xf0]  ;;  %v2527_v52 = vld [vmem:[#allocation5 + $0x200] sm:$0xf] }
  0xa2   :  { %v131_v58 = vpop.xlane.xlu2 %130  ;;  %v125_v61 = vpop.xlane.xlu0 %124  ;;  %194 = vadd.xlane.f32.xlu1 %v193_v54  ;;  %v184_v10 = vsel %vm95_vm0, %v166_v2, 0.0  ;;  %1596 = vmatpush.bf16.msra.mxu0 %v2288_v34  ;;  %v2464_v13 = vor.u32 %v3239_v51, %v2463_v49  ;;  %v2528_v54 = vor.u32 %v3255_v53, %v2527_v52  ;;  %v3287_v26 = vld [vmem:[#allocation5 + $0x30c] sm:$0xf0]  ;;  %v2356_v34 = vor.u32 %v3209_v31, %v2353_v32  ;;  %v2513_v35 = vld [vmem:[#allocation5 + $0x1f0] sm:$0xf0] }
  0xa3   :  { %v150_v1 = vmul.f32 %v3679_v30, %v131_v58  ;;  %v148_v14 = vmul.f32 %v3679_v30, %v125_v61  ;;  %200 = vadd.xlane.f32.xlu2 %v199_v55  ;;  %182 = vadd.xlane.f32.xlu0 %v181_v56  ;;  %v128_v3 = vpop.xlane.xlu1 %127  ;;  %v2687_v55 = vld [vmem:[#allocation5 + $0x340] sm:$0xf]  ;;  %v3295_v56 = vld [vmem:[#allocation5 + $0x34c] sm:$0xf0]  ;;  %v2516_v38 = vor.u32 %v3249_v33, %v2513_v35  ;;  %v3245_v49 = vld [vmem:[#allocation5 + $0x1c4] sm:$0xf] }
  0xa4   :  { %v149_v4 = vmul.f32 %v3679_v30, %v128_v3  ;;  %1636 = vmatpush.bf16.msra.mxu3 %v2704_v44  ;;  %v2688_v58 = vor.u32 %v3295_v56, %v2687_v55  ;;  %v3347_v61 = vld [vmem:[#allocation5 + $0x4ec] sm:$0xf0]  ;;  %v2447_v3 = vld [vmem:[#allocation5 + $0x160] sm:$0xf]  ;;  %v3205_v44 = vld [vmem:[#allocation5 + $0x84] sm:$0xf] }
  0xa5   :  { %v3745_v5 = vsub.f32 %v3667_v18, %v150_v1  ;;  %v3748_v6 = vsub.f32 %v3669_v19, %v148_v14  ;;  %v2385_v1 = vld [vmem:[#allocation5 + $0xf0] sm:$0xf0]  ;;  %1607 = vmatpush.bf16.msra.mxu1 %v2464_v13  ;;  %v2896_v14 = vor.u32 %v3347_v61, %v2895_v57  ;;  %v3339_v0 = vld [vmem:[#allocation5 + $0x4ac] sm:$0xf0]  ;;  %v2847_v42 = vld [vmem:[#allocation5 + $0x480] sm:$0xf]  ;;  %v2340_v51 = vor.u32 %v3205_v44, %v2337_v48 }
  0xa6   :  { %v3756_v8 = vsub.f32 %v3671_v20, %v149_v4  ;;  %v2559_v20 = vld [vmem:[#allocation5 + $0x240] sm:$0xf]  ;;  %1597 = vmatpush.bf16.msra.mxu0 %v2272_v50  ;;  %v2388_v2 = vor.u32 %v3217_v62, %v2385_v1  ;;  %v3235_v4 = vld [vmem:[#allocation5 + $0x16c] sm:$0xf0]  ;;  %v2497_v50 = vld [vmem:[#allocation5 + $0x1d0] sm:$0xf0] }
  0xa7   :  { %v174_v9 = vmul.f32 %v3745_v5, %v3745_v5  ;;  %v172_v7 = vmul.f32 %v3748_v6, %v3748_v6  ;;  %v2560_v27 = vor.u32 %v3263_v25, %v2559_v20  ;;  %v2655_v20 = vld [vmem:[#allocation5 + $0x300] sm:$0xf]  ;;  %v2432_v25 = vor.u32 %v3231_v24, %v2431_v23  ;;  %v3227_v40 = vld [vmem:[#allocation5 + $0x12c] sm:$0xf0]  ;;  %v3201_v62 = vld [vmem:[#allocation5 + $0x64] sm:$0xf] }
  0xa8   :  { %v173_v19 = vmul.f32 %v3756_v8, %v3756_v8  ;;  %1637 = vmatpush.bf16.msra.mxu3 %v2688_v58  ;;  %v2656_v28 = vor.u32 %v3287_v26, %v2655_v20  ;;  %v3335_v43 = vld [vmem:[#allocation5 + $0x48c] sm:$0xf0]  ;;  %v2500_v52 = vor.u32 %v3245_v49, %v2497_v50  ;;  %v2399_v53 = vld [vmem:[#allocation5 + $0x100] sm:$0xf]  ;;  %v2321_v1 = vld [vmem:[#allocation5 + $0x70] sm:$0xf0] }
  0xa9   :  { %v208_v15 = vsel %vm95_vm0, %v174_v9, 0.0  ;;  %v202_v18 = vsel %vm95_vm0, %v172_v7, 0.0  ;;  %1623 = vmatpush.bf16.msra.mxu2 %v2560_v27  ;;  %v2671_v9 = vld [vmem:[#allocation5 + $0x320] sm:$0xf]  ;;  %v2448_v7 = vor.u32 %v3235_v4, %v2447_v3  ;;  %v2848_v47 = vor.u32 %v3335_v43, %v2847_v42  ;;  %v3223_v13 = vld [vmem:[#allocation5 + $0x10c] sm:$0xf0] }
  0xaa   :  { %185 = vadd.xlane.f32.xlu1 %v184_v10  ;;  %v205_v16 = vsel %vm95_vm0, %v173_v19, 0.0  ;;  %v3291_v10 = vld [vmem:[#allocation5 + $0x32c] sm:$0xf0]  ;;  %1646 = vmatpush.bf16.msrb.mxu0 %v2896_v14  ;;  %v2863_v27 = vld [vmem:[#allocation5 + $0x4a0] sm:$0xf] }
  0xab   :  { %209 = vadd.xlane.f32.xlu2 %v208_v15  ;;  %203 = vadd.xlane.f32.xlu0 %v202_v18  ;;  %v2879_v15 = vld [vmem:[#allocation5 + $0x4c0] sm:$0xf]  ;;  %v3343_v18 = vld [vmem:[#allocation5 + $0x4cc] sm:$0xf0]  ;;  %v2672_v19 = vor.u32 %v3291_v10, %v2671_v9  ;;  %v2864_v29 = vor.u32 %v3339_v0, %v2863_v27  ;;  %v3241_v3 = vld [vmem:[#allocation5 + $0x1a4] sm:$0xf] }
  0xac   :  { %1608 = vmatpush.bf16.msra.mxu1 %v2448_v7  ;;  %v2831_v55 = vld [vmem:[#allocation5 + $0x460] sm:$0xf]  ;;  %v3331_v56 = vld [vmem:[#allocation5 + $0x46c] sm:$0xf0]  ;;  %v2481_v4 = vld [vmem:[#allocation5 + $0x1b0] sm:$0xf0] }
  0xad   :  { %1624 = vmatpush.bf16.msra.mxu2 %v2544_v41  ;;  %1638 = vmatpush.bf16.msra.mxu3 %v2672_v19  ;;  %v2416_v41 = vor.u32 %v3227_v40, %v2415_v39  ;;  %v3023_v57 = vld [vmem:[#allocation5 + $0x5e0] sm:$0xf]  ;;  %v2832_v58 = vor.u32 %v3331_v56, %v2831_v55  ;;  %v3379_v61 = vld [vmem:[#allocation5 + $0x5ec] sm:$0xf0]  ;;  %v2484_v7 = vor.u32 %v3241_v3, %v2481_v4  ;;  %v3197_v23 = vld [vmem:[#allocation5 + $0x44] sm:$0xf] }
  0xae   :  { %v3024_v14 = vor.u32 %v3379_v61, %v3023_v57  ;;  %v3327_v19 = vld [vmem:[#allocation5 + $0x44c] sm:$0xf0]  ;;  %v2305_v24 = vld [vmem:[#allocation5 + $0x50] sm:$0xf0]  ;;  %v3237_v27 = vld [vmem:[#allocation5 + $0x184] sm:$0xf] }
  0xaf   :  { %v2308_v26 = vor.u32 %v3197_v23, %v2305_v24  ;;  %v2465_v0 = vld [vmem:[#allocation5 + $0x190] sm:$0xf0]  ;;  %v2799_v31 = vld [vmem:[#allocation5 + $0x420] sm:$0xf]  ;;  %v3323_v32 = vld [vmem:[#allocation5 + $0x42c] sm:$0xf0] }
  0xb0   :  { %1609 = vmatpush.bf16.msra.mxu1 %v2432_v25  ;;  %v2991_v33 = vld [vmem:[#allocation5 + $0x5a0] sm:$0xf]  ;;  %v3371_v35 = vld [vmem:[#allocation5 + $0x5ac] sm:$0xf0]  ;;  %v2289_v39 = vld [vmem:[#allocation5 + $0x30] sm:$0xf0] }
  0xb1   :  { %1625 = vmatpush.bf16.msra.mxu2 %v2528_v54  ;;  %1639 = vmatpush.bf16.msra.mxu3 %v2656_v28  ;;  %v2400_v54 = vor.u32 %v3223_v13, %v2399_v53  ;;  %v2992_v40 = vor.u32 %v3371_v35, %v2991_v33  ;;  %v3233_v42 = vld [vmem:[#allocation5 + $0x164] sm:$0xf]  ;;  %v2449_v43 = vld [vmem:[#allocation5 + $0x170] sm:$0xf0]  ;;  %v2975_v53 = vld [vmem:[#allocation5 + $0x580] sm:$0xf] }
  0xb2   :  { %206 = vadd.xlane.f32.xlu1 %v205_v16  ;;  %v2880_v16 = vor.u32 %v3343_v18, %v2879_v15  ;;  %v2815_v18 = vld [vmem:[#allocation5 + $0x440] sm:$0xf]  ;;  %v3367_v56 = vld [vmem:[#allocation5 + $0x58c] sm:$0xf0]  ;;  %v3189_v57 = vld [vmem:[#allocation5 + $0x4] sm:$0xf] }
  0xb3   :  { %v2816_v21 = vor.u32 %v3327_v19, %v2815_v18  ;;  %v3225_v33 = vld [vmem:[#allocation5 + $0x124] sm:$0xf] }
  0xb4   :  { %1647 = vmatpush.bf16.msrb.mxu0 %v2880_v16  ;;  %1610 = vmatpush.bf16.msra.mxu1 %v2416_v41  ;;  %v3007_v16 = vld [vmem:[#allocation5 + $0x5c0] sm:$0xf] }
  0xb5   :  { %1674 = vmatpush.bf16.msrb.mxu2 %v2388_v2  ;;  %1688 = vmatpush.bf16.msrb.mxu3 %v2516_v38  ;;  %v2324_v2 = vor.u32 %v3201_v62, %v2321_v1  ;;  %v3193_v38 = vld [vmem:[#allocation5 + $0x24] sm:$0xf]  ;;  %v2976_v1 = vor.u32 %v3367_v56, %v2975_v53 }
  0xb6   :  { %v2292_v41 = vor.u32 %v3193_v38, %v2289_v39 }
  0xb8   :  { %1648 = vmatpush.bf16.msrb.mxu0 %v2864_v29  ;;  %1611 = vmatpush.bf16.msra.mxu1 %v2400_v54  ;;  %v2468_v29 = vor.u32 %v3237_v27, %v2465_v0  ;;  %v3363_v27 = vld [vmem:[#allocation5 + $0x56c] sm:$0xf0] }
  0xb9   :  { %1675 = vmatpush.bf16.msrb.mxu2 %v2372_v22  ;;  %1689 = vmatpush.bf16.msrb.mxu3 %v2500_v52  ;;  %v3375_v22 = vld [vmem:[#allocation5 + $0x5cc] sm:$0xf0] }
  0xba   :  { %v3008_v25 = vor.u32 %v3375_v22, %v3007_v16  ;;  %v3319_v52 = vld [vmem:[#allocation5 + $0x40c] sm:$0xf0] }
  0xbc   :  { %1649 = vmatpush.bf16.msrb.mxu0 %v2848_v47  ;;  %1660 = vmatpush.bf16.msrb.mxu1 %v3024_v14  ;;  %v2452_v47 = vor.u32 %v3233_v42, %v2449_v43 }
  0xbd   :  { %1676 = vmatpush.bf16.msrb.mxu2 %v2356_v34  ;;  %1690 = vmatpush.bf16.msrb.mxu3 %v2484_v7  ;;  %v2800_v34 = vor.u32 %v3323_v32, %v2799_v31 }
  0xc0   :  { %1650 = vmatpush.bf16.msrb.mxu0 %v2832_v58  ;;  %1661 = vmatpush.bf16.msrb.mxu1 %v3008_v25  ;;  %v2273_v58 = vld [vmem:[#allocation5 + $0x10] sm:$0xf0] }
  0xc1   :  { %1677 = vmatpush.bf16.msrb.mxu2 %v2340_v51  ;;  %1691 = vmatpush.bf16.msrb.mxu3 %v2468_v29  ;;  %v2783_v51 = vld [vmem:[#allocation5 + $0x400] sm:$0xf]  ;;  %v2276_v14 = vor.u32 %v3189_v57, %v2273_v58  ;;  %v3833_v57 = vld [vmem:[#allocation5 + $0x2e4] sm:$0xf]  ;;  %v3835_v58 = vld [vmem:[#allocation5 + $0x2f0] sm:$0xf0] }
  0xc2   :  { %v2784_v55 = vor.u32 %v3319_v52, %v2783_v51 }
  0xc4   :  { %1651 = vmatpush.bf16.msrb.mxu0 %v2816_v21  ;;  %1662 = vmatpush.bf16.msrb.mxu1 %v2992_v40 }
  0xc5   :  { %1678 = vmatpush.bf16.msrb.mxu2 %v2324_v2  ;;  %1692 = vmatpush.bf16.msrb.mxu3 %v2452_v47  ;;  %v3229_v2 = vld [vmem:[#allocation5 + $0x144] sm:$0xf] }
  0xc8   :  { %1652 = vmatpush.bf16.msrb.mxu0 %v2800_v34  ;;  %1663 = vmatpush.bf16.msrb.mxu1 %v2976_v1  ;;  %v2417_v34 = vld [vmem:[#allocation5 + $0x130] sm:$0xf0] }
  0xc9   :  { %1679 = vmatpush.bf16.msrb.mxu2 %v2308_v26  ;;  %v2959_v26 = vld [vmem:[#allocation5 + $0x560] sm:$0xf]  ;;  %v2420_v38 = vor.u32 %v3225_v33, %v2417_v34 }
  0xca   :  { %v2960_v32 = vor.u32 %v3363_v27, %v2959_v26 }
  0xcc   :  { %1653 = vmatpush.bf16.msrb.mxu0 %v2784_v55  ;;  %1664 = vmatpush.bf16.msrb.mxu1 %v2960_v32 }
  0xcd   :  { %1680 = vmatpush.bf16.msrb.mxu2 %v2292_v41 }
  0xd1   :  { %1681 = vmatpush.bf16.msrb.mxu2 %v2276_v14 }
 0x105   :  { %v189_v9 = vpop.xlane.xlu0 %188 }
 0x106   :  { %v215_v10 = vmul.f32 %v189_v9, %v3679_v30  ;;  %v177_v15 = vpop.xlane.xlu2 %176 }
 0x107   :  { %v211_v17 = vmul.f32 %v177_v15, %v3679_v30 }
 0x108   :  { %v3765_v20 = vadd.f32 1e-05, %v215_v10  ;;  %v2433_v10 = vld [vmem:[#allocation5 + $0x150] sm:$0xf0] }
 0x109   :  { %v3767_v28 = vadd.f32 1e-05, %v211_v17  ;;  %v2436_v16 = vor.u32 %v3229_v2, %v2433_v10 }
 0x10a   :  { %3428 = vrsqrt.f32 %v3765_v20  ;;  %vm281_vm2 = vweird.f32 %v3765_v20 }
 0x10b   :  { %3430 = vrsqrt.f32 %v3767_v28  ;;  %1693 = vmatpush.bf16.msrb.mxu3 %v2436_v16  ;;  %vm241_vm3 = vweird.f32 %v3767_v28 }
 0x10d   :  { %v192_v44 = vpop.xlane.xlu1 %191 }
 0x10e   :  { %v198_v48 = vpop.xlane.xlu2 %197  ;;  %v180_v49 = vpop.xlane.xlu0 %179  ;;  %v216_v50 = vmul.f32 %v192_v44, %v3679_v30 }
 0x10f   :  { %v218_v13 = vmul.f32 %v198_v48, %v3679_v30  ;;  %v212_v54 = vmul.f32 %v180_v49, %v3679_v30  ;;  %1694 = vmatpush.bf16.msrb.mxu3 %v2420_v38 }
 0x110   :  { %v3774_v61 = vpop.eup %3428  ;;  %v3776_v62 = vadd.f32 1e-05, %v216_v50 }
 0x111   :  { %v3778_v3 = vpop.eup %3430  ;;  %v276_v4 = vmul.f32 %v3774_v61, %v3765_v20  ;;  %v3782_v9 = vadd.f32 1e-05, %v218_v13  ;;  %v3784_v7 = vadd.f32 1e-05, %v212_v54  ;;  %vm282_vm4 = vweird.f32 %v3774_v61 }
 0x112   :  { %v236_v15 = vmul.f32 %v3778_v3, %v3767_v28  ;;  %3432 = vrsqrt.f32 %v3776_v62  ;;  %vm242_vm5 = vweird.f32 %v3778_v3  ;;  %vm291_vm7 = vweird.f32 %v3776_v62  ;;  %vm3826_vm8 = vmor %vm281_vm2, %vm282_vm4 }
 0x113   :  { %v277_v18 = vmul.f32 %v3774_v61, %v276_v4  ;;  %3434 = vrsqrt.f32 %v3782_v9  ;;  %vm311_vm6 = vweird.f32 %v3782_v9  ;;  %vm251_vm9 = vweird.f32 %v3784_v7  ;;  %vm3852_vm11 = vmor %vm241_vm3, %vm242_vm5 }
 0x114   :  { %v237_v19 = vmul.f32 %v3778_v3, %v236_v15  ;;  %3436 = vrsqrt.f32 %v3784_v7 }
 0x115   :  { %v278_v17 = vmul.f32 0.5, %v277_v18  ;;  %v195_v21 = vpop.xlane.xlu1 %194  ;;  %v3844_v18 = vld [vmem:[#allocation5 + $0x4e4] sm:$0xf] }
 0x116   :  { %v238_v22 = vmul.f32 0.5, %v237_v19  ;;  %v201_v23 = vpop.xlane.xlu2 %200  ;;  %v183_v24 = vpop.xlane.xlu0 %182  ;;  %v217_v25 = vmul.f32 %v195_v21, %v3679_v30  ;;  %v3846_v19 = vld [vmem:[#allocation5 + $0x4f0] sm:$0xf0]  ;;  %v2644_v21 = vor.u32 %v3833_v57, %v3835_v58 }
 0x117   :  { %v279_v0 = vsub.f32 1.5, %v278_v17  ;;  %v219_v29 = vmul.f32 %v201_v23, %v3679_v30  ;;  %v213_v31 = vmul.f32 %v183_v24, %v3679_v30 }
 0x118   :  { %v3796_v35 = vpop.eup %3432  ;;  %v239_v40 = vsub.f32 1.5, %v238_v22  ;;  %v3818_v51 = vadd.f32 1e-05, %v217_v25 }
 0x119   :  { %v3799_v39 = vpop.eup %3434  ;;  %v286_v41 = vmul.f32 %v3796_v35, %v3776_v62  ;;  %v3804_v42 = vadd.f32 1e-05, %v219_v29  ;;  %v280_v44 = vmul.f32 %v3774_v61, %v279_v0  ;;  %v3812_v48 = vadd.f32 1e-05, %v213_v31 }
 0x11a   :  { %v3806_v43 = vpop.eup %3436  ;;  %v306_v47 = vmul.f32 %v3799_v39, %v3782_v9  ;;  %v240_v13 = vmul.f32 %v3778_v3, %v239_v40  ;;  %vm292_vm10 = vweird.f32 %v3796_v35  ;;  %vm312_vm13 = vweird.f32 %v3799_v39 }
 0x11b   :  { %v246_v49 = vmul.f32 %v3806_v43, %v3784_v7  ;;  %v287_v50 = vmul.f32 %v3796_v35, %v286_v41  ;;  %3438 = vrsqrt.f32 %v3804_v42  ;;  %v284_v20 = vsel %vm3826_vm8, %v3774_v61, %v280_v44  ;;  %vm293_vm14 = vmor %vm291_vm7, %vm292_vm10  ;;  %v3939_v61 = vld [vmem:[#allocation5 + $0x2d0] sm:$0xf0] }
 0x11c   :  { %v307_v52 = vmul.f32 %v3799_v39, %v306_v47  ;;  %3440 = vrsqrt.f32 %v3812_v48  ;;  %vm252_vm12 = vweird.f32 %v3806_v43  ;;  %v244_v22 = vsel %vm3852_vm11, %v3778_v3, %v240_v13  ;;  %vm3912_vm3 = vmor %vm311_vm6, %vm312_vm13 }
 0x11d   :  { %v247_v54 = vmul.f32 %v3806_v43, %v246_v49  ;;  %v288_v55 = vmul.f32 0.5, %v287_v50  ;;  %v186_v56 = vpop.xlane.xlu1 %185  ;;  %3442 = vrsqrt.f32 %v3818_v51  ;;  %v3870_v26 = vmul.f32 %v284_v20, %v3683_v36  ;;  %vm253_vm15 = vmor %vm251_vm9, %vm252_vm12 }
 0x11e   :  { %v308_v1 = vmul.f32 0.5, %v307_v52  ;;  %v210_v14 = vpop.xlane.xlu2 %209  ;;  %v204_v2 = vpop.xlane.xlu0 %203  ;;  %v214_v17 = vmul.f32 %v186_v56, %v3679_v30  ;;  %v2900_v3 = vor.u32 %v3844_v18, %v3846_v19  ;;  %v355_v33 = vmul.f32 %v244_v22, %v3685_v37  ;;  %v3337_v19 = vld [vmem:[#allocation5 + $0x4a4] sm:$0xf] }
 0x11f   :  { %v248_v4 = vmul.f32 0.5, %v247_v54  ;;  %v289_v10 = vsub.f32 1.5, %v288_v55  ;;  %v222_v15 = vmul.f32 %v210_v14, %v3679_v30  ;;  %v220_v16 = vmul.f32 %v204_v2, %v3679_v30  ;;  %v3269_v22 = vld [vmem:[#allocation5 + $0x284] sm:$0xf] }
 0x120   :  { %v309_v27 = vsub.f32 1.5, %v308_v1  ;;  %vm321_vm1 = vweird.f32 %v3804_v42  ;;  %v3894_v62 = vadd.f32 1e-05, %v214_v17  ;;  %vm261_vm2 = vweird.f32 %v3812_v48 }
 0x121   :  { %v249_v23 = vsub.f32 1.5, %v248_v4  ;;  %v290_v28 = vmul.f32 %v3796_v35, %v289_v10  ;;  %v3865_v24 = vadd.f32 1e-05, %v222_v15  ;;  %v3867_v25 = vpop.eup %3438  ;;  %v3883_v36 = vadd.f32 1e-05, %v220_v16 }
 0x122   :  { %v316_v31 = vmul.f32 %v3867_v25, %v3804_v42  ;;  %v3885_v32 = vpop.eup %3440  ;;  %v310_v7 = vmul.f32 %v3799_v39, %v309_v27  ;;  %vm301_vm4 = vweird.f32 %v3818_v51  ;;  %v367_v52 = vpack.c.bf16 %v355_v33, %v355_v33  ;;  %v3937_v15 = vld [vmem:[#allocation5 + $0x2c4] sm:$0xf]  ;;  %v2943_v42 = vld [vmem:[#allocation5 + $0x540] sm:$0xf] }
 0x123   :  { %v250_v0 = vmul.f32 %v3806_v43, %v249_v23  ;;  %v294_v29 = vsel %vm293_vm14, %v3796_v35, %v290_v28  ;;  %3444 = vrsqrt.f32 %v3865_v24  ;;  %v3896_v34 = vpop.eup %3442  ;;  %v256_v37 = vmul.f32 %v3885_v32, %v3812_v48 }
 0x124   :  { %v360_v38 = vmul.f32 %v294_v29, %v3701_v60  ;;  %v317_v40 = vmul.f32 %v3867_v25, %v316_v31  ;;  %v296_v47 = vmul.f32 %v3896_v34, %v3818_v51  ;;  %3446 = vrsqrt.f32 %v3883_v36  ;;  %v3359_v29 = vld [vmem:[#allocation5 + $0x54c] sm:$0xf0] }
 0x125   :  { %v254_v35 = vsel %vm253_vm15, %v3806_v43, %v250_v0  ;;  %v207_v41 = vpop.xlane.xlu1 %206  ;;  %v257_v49 = vmul.f32 %v3885_v32, %v256_v37  ;;  %3448 = vrsqrt.f32 %v3894_v62  ;;  %v314_v56 = vsel %vm3912_vm3, %v3799_v39, %v310_v7  ;;  %v2401_v37 = vld [vmem:[#allocation5 + $0x110] sm:$0xf0] }
 0x126   :  { %v356_v44 = vmul.f32 %v254_v35, %v3704_v63  ;;  %v318_v43 = vmul.f32 0.5, %v317_v40  ;;  %v297_v63 = vmul.f32 %v3896_v34, %v296_v47  ;;  %v221_v50 = vmul.f32 %v207_v41, %v3679_v30  ;;  %v3221_v40 = vld [vmem:[#allocation5 + $0x104] sm:$0xf] }
 0x127   :  { %v258_v9 = vmul.f32 0.5, %v257_v49  ;;  %v372_v54 = vpack.c.bf16 %v360_v38, %v360_v38  ;;  %vm322_vm5 = vweird.f32 %v3867_v25  ;;  %vm302_vm6 = vweird.f32 %v3896_v34  ;;  %v2881_v49 = vld [vmem:[#allocation5 + $0x4d0] sm:$0xf0] }
 0x128   :  { %v319_v53 = vsub.f32 1.5, %v318_v43  ;;  %v368_v13 = vpack.c.bf16 %v356_v44, %v356_v44  ;;  %v298_v20 = vmul.f32 0.5, %v297_v63  ;;  %v3928_v1 = vadd.f32 1e-05, %v221_v50  ;;  %vm3950_vm7 = vmor %vm321_vm1, %vm322_vm5 }
 0x129   :  { %v3922_v55 = vpop.eup %3444  ;;  %v259_v14 = vsub.f32 1.5, %v258_v9  ;;  %v371_v2 = vpack.c.bf16 %v3870_v26, %v3870_v26  ;;  %v3944_v17 = vmul.f32 %v314_v56, %v3698_v59  ;;  %vm262_vm8 = vweird.f32 %v3885_v32  ;;  %vm303_vm10 = vmor %vm301_vm4, %vm302_vm6  ;;  %v2609_v9 = vld [vmem:[#allocation5 + $0x2b0] sm:$0xf0] }
 0x12a   :  { %v346_v30 = vmul.f32 %v3922_v55, %v3865_v24  ;;  %v320_v4 = vmul.f32 %v3867_v25, %v319_v53  ;;  %v299_v10 = vsub.f32 1.5, %v298_v20  ;;  %3450 = vrsqrt.f32 %v3928_v1  ;;  %v3941_v16 = vpop.eup %3446  ;;  %vm3983_vm12 = vmor %vm261_vm2, %vm262_vm8  ;;  %v3273_v53 = vld [vmem:[#allocation5 + $0x2a4] sm:$0xf] }
 0x12b   :  { %v382_v39 = vunpack.c.l.b16 %v368_v13  ;;  %v381_v23 = vunpack.c.l.b16 %v367_v52  ;;  %v392_v28 = vunpack.c.l.b16 %v372_v54  ;;  %v3955_v26 = vpop.eup %3448  ;;  %v260_v27 = vmul.f32 %v3885_v32, %v259_v14  ;;  %v3025_v14 = vld [vmem:[#allocation5 + $0x5f0] sm:$0xf0] }
 0x12c   :  { %v300_v0 = vmul.f32 %v3896_v34, %v299_v10  ;;  %v326_v59 = vmul.f32 %v3941_v16, %v3883_v36  ;;  %vm331_vm9 = vweird.f32 %v3883_v36  ;;  %v347_v31 = vmul.f32 %v3922_v55, %v346_v30  ;;  %v2927_v10 = vld [vmem:[#allocation5 + $0x520] sm:$0xf] }
 0x12d   :  { %v266_v33 = vmul.f32 %v3955_v26, %v3894_v62  ;;  %vm271_vm11 = vweird.f32 %v3894_v62  ;;  %v391_v35 = vunpack.c.l.b16 %v371_v2  ;;  %v2628_v38 = vor.u32 %v3937_v15, %v3939_v61 }
 0x12e   :  { %v324_v41 = vsel %vm3950_vm7, %v3867_v25, %v320_v4  ;;  %v304_v51 = vsel %vm303_vm10, %v3896_v34, %v300_v0  ;;  %v327_v7 = vmul.f32 %v3941_v16, %v326_v59  ;;  %v3977_v44 = vpack.c.b16 %v382_v39, %v381_v23  ;;  %v3341_v34 = vld [vmem:[#allocation5 + $0x4c4] sm:$0xf]  ;;  %v3355_v39 = vld [vmem:[#allocation5 + $0x52c] sm:$0xf0]  ;;  %v2593_v23 = vld [vmem:[#allocation5 + $0x290] sm:$0xf0] }
 0x12f   :  { %v361_v60 = vmul.f32 %v304_v51, %v3711_v11  ;;  %vm332_vm13 = vweird.f32 %v3941_v16  ;;  %v267_v25 = vmul.f32 %v3955_v26, %v266_v33  ;;  %v3990_v43 = vpack.c.b16 %v392_v28, %v391_v35  ;;  %v2911_v59 = vld [vmem:[#allocation5 + $0x500] sm:$0xf]  ;;  %v3373_v35 = vld [vmem:[#allocation5 + $0x5c4] sm:$0xf] }
 0x130   :  { %v3992_v63 = vpop.eup %3450  ;;  %v264_v48 = vsel %vm3983_vm12, %v3885_v32, %v260_v27  ;;  %v328_v50 = vmul.f32 0.5, %v327_v7  ;;  %3037 = vmatmul.msk.bf16.vlgmr.msra.gmra.mxu0 %vm95_vm0, %v3977_v44  ;;  %v2944_v52 = vor.u32 %v3359_v29, %v2943_v42  ;;  %v2404_v11 = vor.u32 %v3221_v40, %v2401_v37  ;;  %v3377_v32 = vld [vmem:[#allocation5 + $0x5e4] sm:$0xf]  ;;  %vm4023_vm14 = vmor %vm331_vm9, %vm332_vm13  ;;  %v3351_v42 = vld [vmem:[#allocation5 + $0x50c] sm:$0xf0] }
 0x131   :  { %v4000_v13 = vmul.f32 %v324_v41, %v3724_v45  ;;  %v4002_v54 = vmul.f32 0.5, %v347_v31  ;;  %v268_v56 = vmul.f32 0.5, %v267_v25  ;;  %v336_v20 = vmul.f32 %v3992_v63, %v3928_v1  ;;  %3039 = vmatmul.msk.bf16.vlgmr.msra.gmra.mxu2 %vm95_vm0, %v3990_v43  ;;  %1702 = vmatpush.bf16.msra.mxu0 %v2644_v21  ;;  %v2865_v21 = vld [vmem:[#allocation5 + $0x4b0] sm:$0xf0]  ;;  %v3333_v51 = vld [vmem:[#allocation5 + $0x484] sm:$0xf] }
 0x132   :  { %v329_v30 = vsub.f32 1.5, %v328_v50  ;;  %1730 = vmatpush.bf16.msra.mxu2 %v2900_v3  ;;  %v2884_v45 = vor.u32 %v3341_v34, %v2881_v49  ;;  %1665 = vmatpush.bf16.msrb.mxu1 %v2944_v52  ;;  %v373_v2 = vpack.c.bf16 %v361_v60, %v361_v60  ;;  %v374_v4 = vpack.c.bf16 %v3944_v17, %v3944_v17  ;;  %v2849_v7 = vld [vmem:[#allocation5 + $0x490] sm:$0xf0]  ;;  %v3313_v52 = vld [vmem:[#allocation5 + $0x3e4] sm:$0xf] }
 0x133   :  { %v4017_v15 = vmul.f32 %v264_v48, %v3727_v46  ;;  %v269_v58 = vsub.f32 1.5, %v268_v56  ;;  %vm272_vm15 = vweird.f32 %v3955_v26  ;;  %v337_v18 = vmul.f32 %v3992_v63, %v336_v20  ;;  %1695 = vmatpush.bf16.msrb.mxu3 %v2404_v11  ;;  %v3265_v48 = vld [vmem:[#allocation5 + $0x264] sm:$0xf]  ;;  %v2577_v50 = vld [vmem:[#allocation5 + $0x270] sm:$0xf0] }
 0x134   :  { %v330_v3 = vmul.f32 %v3941_v16, %v329_v30  ;;  %v396_v46 = vunpack.c.l.b16 %v373_v2  ;;  %v397_v61 = vunpack.c.l.b16 %v374_v4  ;;  %v2612_v17 = vor.u32 %v3273_v53, %v2609_v9  ;;  %vm273_vm1 = vmor %vm271_vm11, %vm272_vm15  ;;  %v2833_v56 = vld [vmem:[#allocation5 + $0x470] sm:$0xf0]  ;;  %v3369_v30 = vld [vmem:[#allocation5 + $0x5a4] sm:$0xf] }
 0x135   :  { %v270_v36 = vmul.f32 %v3955_v26, %v269_v58  ;;  %v338_v28 = vmul.f32 0.5, %v337_v18  ;;  %1703 = vmatpush.bf16.msra.mxu0 %v2628_v38  ;;  %v3028_v27 = vor.u32 %v3377_v32, %v3025_v14  ;;  %v2928_v0 = vor.u32 %v3355_v39, %v2927_v10  ;;  %v3009_v38 = vld [vmem:[#allocation5 + $0x5d0] sm:$0xf0]  ;;  %v3261_v39 = vld [vmem:[#allocation5 + $0x244] sm:$0xf] }
 0x136   :  { %v334_v29 = vsel %vm4023_vm14, %v3941_v16, %v330_v3  ;;  %vm341_vm2 = vweird.f32 %v3928_v1  ;;  %1731 = vmatpush.bf16.msra.mxu2 %v2884_v45  ;;  %v4039_v31 = vpack.c.b16 %v397_v61, %v396_v46  ;;  %v2868_v33 = vor.u32 %v3337_v19, %v2865_v21  ;;  %v2993_v45 = vld [vmem:[#allocation5 + $0x5b0] sm:$0xf0]  ;;  %v3309_v19 = vld [vmem:[#allocation5 + $0x3c4] sm:$0xf]  ;;  %v2631_v1 = vld [vmem:[#allocation5 + $0x2c8] sm:$0xf] }
 0x137   :  { %v349_v40 = vsub.f32 1.5, %v4002_v54  ;;  %v364_v37 = vmul.f32 %v334_v29, %v3748_v6  ;;  %v274_v41 = vsel %vm273_vm1, %v3955_v26, %v270_v36  ;;  %v339_v16 = vsub.f32 1.5, %v338_v28  ;;  %1666 = vmatpush.bf16.msrb.mxu1 %v2928_v0  ;;  %v3329_v54 = vld [vmem:[#allocation5 + $0x464] sm:$0xf]  ;;  %v2561_v18 = vld [vmem:[#allocation5 + $0x250] sm:$0xf0] }
 0x138   :  { %v358_v62 = vmul.f32 %v274_v41, %v3734_v12  ;;  %3040 = vmatmul.msk.bf16.vlgmr.msra.gmra.mxu3 %vm95_vm0, %v4039_v31  ;;  %v2912_v47 = vor.u32 %v3351_v42, %v2911_v59  ;;  %v369_v60 = vpack.c.bf16 %v4017_v15, %v4017_v15  ;;  %v375_v25 = vpack.c.bf16 %v4000_v13, %v4000_v13  ;;  %v2769_v13 = vld [vmem:[#allocation5 + $0x3f0] sm:$0xf0]  ;;  %v3325_v61 = vld [vmem:[#allocation5 + $0x444] sm:$0xf] }
 0x139   :  { %vm342_vm3 = vweird.f32 %v3992_v63  ;;  %1704 = vmatpush.bf16.msra.mxu0 %v2612_v17  ;;  %1744 = vmatpush.bf16.msra.mxu3 %v3028_v27  ;;  %v2596_v6 = vor.u32 %v3269_v22, %v2593_v23  ;;  %v3012_v26 = vor.u32 %v3373_v35, %v3009_v38  ;;  %v376_v34 = vpack.c.bf16 %v364_v37, %v364_v37  ;;  %v2753_v46 = vld [vmem:[#allocation5 + $0x3d0] sm:$0xf0]  ;;  %v3257_v0 = vld [vmem:[#allocation5 + $0x224] sm:$0xf] }
 0x13a   :  { %vm351_vm4 = vweird.f32 %v3865_v24  ;;  %1732 = vmatpush.bf16.msra.mxu2 %v2868_v33  ;;  %v2852_v12 = vor.u32 %v3333_v51, %v2849_v7  ;;  %v370_v49 = vpack.c.bf16 %v358_v62, %v358_v62  ;;  %vm352_vm5 = vweird.f32 %v3922_v55  ;;  %vm4059_vm6 = vmor %vm341_vm2, %vm342_vm3  ;;  %v2817_v17 = vld [vmem:[#allocation5 + $0x450] sm:$0xf0]  ;;  %v3365_v24 = vld [vmem:[#allocation5 + $0x584] sm:$0xf] }
 0x13b   :  { %v340_v11 = vmul.f32 %v3992_v63, %v339_v16  ;;  %1667 = vmatpush.bf16.msrb.mxu1 %v2912_v47  ;;  %v401_v53 = vunpack.c.l.b16 %v375_v25  ;;  %v402_v9 = vunpack.c.l.b16 %v376_v34  ;;  %v386_v32 = vunpack.c.l.b16 %v369_v60  ;;  %vm4070_vm7 = vmor %vm351_vm4, %vm352_vm5  ;;  %v2977_v22 = vld [vmem:[#allocation5 + $0x590] sm:$0xf0]  ;;  %v3305_v42 = vld [vmem:[#allocation5 + $0x3a4] sm:$0xf] }
 0x13c   :  { %v387_v14 = vunpack.c.l.b16 %v370_v49  ;;  %v350_v2 = vmul.f32 %v3922_v55, %v349_v40  ;;  %v2580_v10 = vor.u32 %v3265_v48, %v2577_v50  ;;  %v2772_v57 = vor.u32 %v3313_v52, %v2769_v13  ;;  %v2545_v59 = vld [vmem:[#allocation5 + $0x230] sm:$0xf0]  ;;  %v3321_v35 = vld [vmem:[#allocation5 + $0x424] sm:$0xf]  ;;  %v3220_v49 = vld [vmem:[#allocation5 + $0xf4] sm:$0xf0] }
 0x13d   :  { %1705 = vmatpush.bf16.msra.mxu0 %v2596_v6  ;;  %1745 = vmatpush.bf16.msra.mxu3 %v3012_v26  ;;  %v4064_v4 = vpack.c.b16 %v402_v9, %v401_v53  ;;  %v2836_v58 = vor.u32 %v3329_v54, %v2833_v56  ;;  %v344_v21 = vsel %vm4059_vm6, %v3992_v63, %v340_v11  ;;  %v2737_v33 = vld [vmem:[#allocation5 + $0x3b0] sm:$0xf0]  ;;  %v3361_v40 = vld [vmem:[#allocation5 + $0x564] sm:$0xf]  ;;  %v2647_v52 = vld [vmem:[#allocation5 + $0x2e8] sm:$0xf] }
 0x13e   :  { %1733 = vmatpush.bf16.msra.mxu2 %v2852_v12  ;;  %v4074_v15 = vpack.c.b16 %v387_v14, %v386_v32  ;;  %v2996_v3 = vor.u32 %v3369_v30, %v2993_v45  ;;  %v354_v23 = vsel %vm4070_vm7, %v3922_v55, %v350_v2  ;;  %v2564_v63 = vor.u32 %v3261_v39, %v2561_v18  ;;  %v2801_v38 = vld [vmem:[#allocation5 + $0x430] sm:$0xf0]  ;;  %v3253_v16 = vld [vmem:[#allocation5 + $0x204] sm:$0xf]  ;;  %v2391_v12 = vld [vmem:[#allocation5 + $0xe8] sm:$0xf] }
 0x13f   :  { %v365_v36 = vmul.f32 %v344_v21, %v3756_v8  ;;  %v2756_v28 = vor.u32 %v3309_v19, %v2753_v46  ;;  %v2820_v27 = vor.u32 %v3325_v61, %v2817_v17  ;;  %v2980_v29 = vor.u32 %v3365_v24, %v2977_v22  ;;  %v2961_v37 = vld [vmem:[#allocation5 + $0x570] sm:$0xf0]  ;;  %v3301_v62 = vld [vmem:[#allocation5 + $0x384] sm:$0xf]  ;;  %v3284_v11 = vld [vmem:[#allocation5 + $0x2f4] sm:$0xf0] }
 0x140   :  { %3038 = vmatmul.msk.bf16.vlgmr.msra.gmra.mxu1 %vm95_vm0, %v4074_v15  ;;  %3041 = vmatmul.msk.bf16.vlgmr.msrb.gmra.mxu0 %vm95_vm0, %v4064_v4  ;;  %v366_v55 = vmul.f32 %v354_v23, %v3745_v5  ;;  %v2548_v41 = vor.u32 %v3257_v0, %v2545_v59  ;;  %v2740_v8 = vor.u32 %v3305_v42, %v2737_v33  ;;  %v2529_v7 = vld [vmem:[#allocation5 + $0x210] sm:$0xf0]  ;;  %v3317_v6 = vld [vmem:[#allocation5 + $0x404] sm:$0xf]  ;;  %v3216_v39 = vld [vmem:[#allocation5 + $0xd4] sm:$0xf0] }
 0x141   :  { %3043 = vmatmul.msk.bf16.vlgmr.msrb.gmra.mxu2 %vm95_vm0, %v3977_v44  ;;  %1706 = vmatpush.bf16.msra.mxu0 %v2580_v10  ;;  %v2804_v51 = vor.u32 %v3321_v35, %v2801_v38  ;;  %v2721_v47 = vld [vmem:[#allocation5 + $0x390] sm:$0xf0]  ;;  %v377_v60 = vpack.c.bf16 %v365_v36, %v365_v36  ;;  %v2964_v25 = vor.u32 %v3361_v40, %v2961_v37  ;;  %v3357_v34 = vld [vmem:[#allocation5 + $0x544] sm:$0xf]  ;;  %v2375_v10 = vld [vmem:[#allocation5 + $0xc8] sm:$0xf] }
 0x142   :  { %1716 = vmatpush.bf16.msra.mxu1 %v2772_v57  ;;  %1734 = vmatpush.bf16.msra.mxu2 %v2836_v58  ;;  %v2785_v26 = vld [vmem:[#allocation5 + $0x410] sm:$0xf0]  ;;  %v378_v48 = vpack.c.bf16 %v366_v55, %v366_v55  ;;  %v2532_v50 = vor.u32 %v3253_v16, %v2529_v7  ;;  %v2724_v53 = vor.u32 %v3301_v62, %v2721_v47  ;;  %v3297_v20 = vld [vmem:[#allocation5 + $0x364] sm:$0xf]  ;;  %v3280_v57 = vld [vmem:[#allocation5 + $0x2d4] sm:$0xf0] }
 0x143   :  { %1746 = vmatpush.bf16.msra.mxu3 %v2996_v3  ;;  %v2945_v5 = vld [vmem:[#allocation5 + $0x550] sm:$0xf0]  ;;  %v2788_v9 = vor.u32 %v3317_v6, %v2785_v26  ;;  %v406_v13 = vunpack.c.l.b16 %v377_v60  ;;  %v2392_v56 = vor.u32 %v3220_v49, %v2391_v12  ;;  %v3353_v14 = vld [vmem:[#allocation5 + $0x524] sm:$0xf]  ;;  %v2648_v30 = vor.u32 %v3284_v11, %v2647_v52  ;;  %v2359_v22 = vld [vmem:[#allocation5 + $0xa8] sm:$0xf] }
 0x144   :  { %v2948_v54 = vor.u32 %v3357_v34, %v2945_v5  ;;  %v2705_v32 = vld [vmem:[#allocation5 + $0x370] sm:$0xf0]  ;;  %v407_v45 = vunpack.c.l.b16 %v378_v48  ;;  %v3293_v19 = vld [vmem:[#allocation5 + $0x344] sm:$0xf]  ;;  %v2376_v3 = vor.u32 %v3216_v39, %v2375_v10  ;;  %v2632_v24 = vor.u32 %v3280_v57, %v2631_v1  ;;  %v3212_v23 = vld [vmem:[#allocation5 + $0xb4] sm:$0xf0] }
 0x145   :  { %1707 = vmatpush.bf16.msra.mxu0 %v2564_v63  ;;  %v2929_v2 = vld [vmem:[#allocation5 + $0x530] sm:$0xf0]  ;;  %v2708_v18 = vor.u32 %v3297_v20, %v2705_v32  ;;  %v3349_v61 = vld [vmem:[#allocation5 + $0x504] sm:$0xf]  ;;  %v2615_v63 = vld [vmem:[#allocation5 + $0x2a8] sm:$0xf]  ;;  %v2360_v42 = vor.u32 %v3212_v23, %v2359_v22 }
 0x146   :  { %1717 = vmatpush.bf16.msra.mxu1 %v2756_v28  ;;  %1735 = vmatpush.bf16.msra.mxu2 %v2820_v27  ;;  %v4092_v58 = vpack.c.b16 %v407_v45, %v406_v13  ;;  %v2932_v21 = vor.u32 %v3353_v14, %v2929_v2  ;;  %v2689_v46 = vld [vmem:[#allocation5 + $0x350] sm:$0xf0]  ;;  %v3276_v36 = vld [vmem:[#allocation5 + $0x2b4] sm:$0xf0]  ;;  %v2775_v28 = vld [vmem:[#allocation5 + $0x3e8] sm:$0xf] }
 0x147   :  { %1747 = vmatpush.bf16.msra.mxu3 %v2980_v29  ;;  %v2913_v17 = vld [vmem:[#allocation5 + $0x510] sm:$0xf0]  ;;  %v3316_v27 = vld [vmem:[#allocation5 + $0x3f4] sm:$0xf0]  ;;  %v2692_v0 = vor.u32 %v3293_v19, %v2689_v46  ;;  %v3289_v29 = vld [vmem:[#allocation5 + $0x324] sm:$0xf]  ;;  %v2616_v35 = vor.u32 %v3276_v36, %v2615_v63 }
 0x148   :  { %3044 = vmatmul.msk.bf16.vlgmr.msrb.gmra.mxu3 %vm95_vm0, %v4074_v15  ;;  %v2916_v59 = vor.u32 %v3349_v61, %v2913_v17  ;;  %v2673_v33 = vld [vmem:[#allocation5 + $0x330] sm:$0xf0]  ;;  %v2776_v38 = vor.u32 %v3316_v27, %v2775_v28  ;;  %v2343_v55 = vld [vmem:[#allocation5 + $0x88] sm:$0xf]  ;;  %v3208_v40 = vld [vmem:[#allocation5 + $0x94] sm:$0xf0] }
 0x149   :  { %1708 = vmatpush.bf16.msra.mxu0 %v2548_v41  ;;  %v2599_v37 = vld [vmem:[#allocation5 + $0x288] sm:$0xf]  ;;  %v3272_v41 = vld [vmem:[#allocation5 + $0x294] sm:$0xf0]  ;;  %v3285_v7 = vld [vmem:[#allocation5 + $0x304] sm:$0xf]  ;;  %v2344_v62 = vor.u32 %v3208_v40, %v2343_v55 }
 0x14a   :  { %1718 = vmatpush.bf16.msra.mxu1 %v2740_v8  ;;  %1736 = vmatpush.bf16.msra.mxu2 %v2804_v51  ;;  %v2759_v16 = vld [vmem:[#allocation5 + $0x3c8] sm:$0xf]  ;;  %v3312_v8 = vld [vmem:[#allocation5 + $0x3d4] sm:$0xf0]  ;;  %v2676_v51 = vor.u32 %v3289_v29, %v2673_v33  ;;  %v2657_v47 = vld [vmem:[#allocation5 + $0x310] sm:$0xf0]  ;;  %v2600_v6 = vor.u32 %v3272_v41, %v2599_v37 }
 0x14b   :  { %1748 = vmatpush.bf16.msra.mxu3 %v2964_v25  ;;  %v2327_v60 = vld [vmem:[#allocation5 + $0x68] sm:$0xf]  ;;  %v3204_v25 = vld [vmem:[#allocation5 + $0x74] sm:$0xf0]  ;;  %v2760_v26 = vor.u32 %v3312_v8, %v2759_v16  ;;  %v2660_v52 = vor.u32 %v3285_v7, %v2657_v47  ;;  %v3218_v40 = vld [vmem:[#allocation5 + $0xec] sm:$0xf] }
 0x14c   :  { %v2519_v34 = vld [vmem:[#allocation5 + $0x1e8] sm:$0xf]  ;;  %v3252_v5 = vld [vmem:[#allocation5 + $0x1f4] sm:$0xf0]  ;;  %v2328_v11 = vor.u32 %v3204_v25, %v2327_v60  ;;  %v2393_v37 = vld [vmem:[#allocation5 + $0xf8] sm:$0xf0] }
 0x14d   :  { %1709 = vmatpush.bf16.msra.mxu0 %v2532_v50  ;;  %v2583_v12 = vld [vmem:[#allocation5 + $0x268] sm:$0xf]  ;;  %v3268_v49 = vld [vmem:[#allocation5 + $0x274] sm:$0xf0]  ;;  %v2396_v60 = vor.u32 %v3218_v40, %v2393_v37 }
 0x14e   :  { %1719 = vmatpush.bf16.msra.mxu1 %v2724_v53  ;;  %1737 = vmatpush.bf16.msra.mxu2 %v2788_v9  ;;  %v2743_v48 = vld [vmem:[#allocation5 + $0x3a8] sm:$0xf]  ;;  %v3308_v50 = vld [vmem:[#allocation5 + $0x3b4] sm:$0xf0]  ;;  %v2520_v53 = vor.u32 %v3252_v5, %v2519_v34  ;;  %v3214_v5 = vld [vmem:[#allocation5 + $0xcc] sm:$0xf] }
 0x14f   :  { %1749 = vmatpush.bf16.msra.mxu3 %v2948_v54  ;;  %v2311_v9 = vld [vmem:[#allocation5 + $0x48] sm:$0xf]  ;;  %v3200_v13 = vld [vmem:[#allocation5 + $0x54] sm:$0xf0]  ;;  %v2584_v54 = vor.u32 %v3268_v49, %v2583_v12  ;;  %v2377_v12 = vld [vmem:[#allocation5 + $0xd8] sm:$0xf0] }
 0x150   :  { %3042 = vmatmul.msk.bf16.vlgmr.msrb.gmra.mxu1 %vm95_vm0, %v4092_v58  ;;  %3045 = vmatmul.msk.bf16.vlgmr.msra.gmra.mxu0 %vm95_vm0, %v3990_v43  ;;  %v2503_v20 = vld [vmem:[#allocation5 + $0x1c8] sm:$0xf]  ;;  %v3248_v32 = vld [vmem:[#allocation5 + $0x1d4] sm:$0xf0]  ;;  %v2312_v10 = vor.u32 %v3200_v13, %v2311_v9 }
 0x151   :  { %1758 = vmatpush.bf16.msrb.mxu0 %v2392_v56  ;;  %3047 = vmatmul.msk.bf16.vlgmr.msra.gmra.mxu2 %vm95_vm0, %v4064_v4  ;;  %v2744_v56 = vor.u32 %v3308_v50, %v2743_v48  ;;  %v2567_v14 = vld [vmem:[#allocation5 + $0x248] sm:$0xf]  ;;  %v3304_v2 = vld [vmem:[#allocation5 + $0x394] sm:$0xf0]  ;;  %v2504_v39 = vor.u32 %v3248_v32, %v2503_v20  ;;  %v3210_v20 = vld [vmem:[#allocation5 + $0xac] sm:$0xf] }
 0x152   :  { %1786 = vmatpush.bf16.msrb.mxu2 %v2648_v30  ;;  %1720 = vmatpush.bf16.msra.mxu1 %v2708_v18  ;;  %v3264_v30 = vld [vmem:[#allocation5 + $0x254] sm:$0xf0]  ;;  %v2727_v45 = vld [vmem:[#allocation5 + $0x388] sm:$0xf]  ;;  %v2361_v32 = vld [vmem:[#allocation5 + $0xb8] sm:$0xf0] }
 0x153   :  { %1750 = vmatpush.bf16.msra.mxu3 %v2932_v21  ;;  %v2295_v1 = vld [vmem:[#allocation5 + $0x28] sm:$0xf]  ;;  %v3196_v57 = vld [vmem:[#allocation5 + $0x34] sm:$0xf0]  ;;  %v2568_v18 = vor.u32 %v3264_v30, %v2567_v14  ;;  %v2728_v19 = vor.u32 %v3304_v2, %v2727_v45  ;;  %v3250_v30 = vld [vmem:[#allocation5 + $0x1ec] sm:$0xf] }
 0x154   :  { %v2487_v21 = vld [vmem:[#allocation5 + $0x1a8] sm:$0xf]  ;;  %v3260_v61 = vld [vmem:[#allocation5 + $0x234] sm:$0xf0]  ;;  %v2296_v22 = vor.u32 %v3196_v57, %v2295_v1  ;;  %v2521_v45 = vld [vmem:[#allocation5 + $0x1f8] sm:$0xf0]  ;;  %v2364_v57 = vor.u32 %v3210_v20, %v2361_v32 }
 0x155   :  { %1759 = vmatpush.bf16.msrb.mxu0 %v2376_v3  ;;  %v3244_v3 = vld [vmem:[#allocation5 + $0x1b4] sm:$0xf0]  ;;  %v2551_v46 = vld [vmem:[#allocation5 + $0x228] sm:$0xf] }
 0x156   :  { %1787 = vmatpush.bf16.msrb.mxu2 %v2632_v24  ;;  %1721 = vmatpush.bf16.msra.mxu1 %v2692_v0  ;;  %v2711_v17 = vld [vmem:[#allocation5 + $0x368] sm:$0xf]  ;;  %v3300_v24 = vld [vmem:[#allocation5 + $0x374] sm:$0xf0]  ;;  %v2488_v23 = vor.u32 %v3244_v3, %v2487_v21  ;;  %v2552_v27 = vor.u32 %v3260_v61, %v2551_v46  ;;  %v3206_v3 = vld [vmem:[#allocation5 + $0x8c] sm:$0xf] }
 0x157   :  { %1751 = vmatpush.bf16.msra.mxu3 %v2916_v59  ;;  %v2279_v63 = vld [vmem:[#allocation5 + $0x8] sm:$0xf]  ;;  %v3192_v36 = vld [vmem:[#allocation5 + $0x14] sm:$0xf0]  ;;  %v2712_v0 = vor.u32 %v3300_v24, %v2711_v17  ;;  %v2345_v46 = vld [vmem:[#allocation5 + $0x98] sm:$0xf0] }
 0x158   :  { %v2471_v28 = vld [vmem:[#allocation5 + $0x188] sm:$0xf]  ;;  %v3240_v59 = vld [vmem:[#allocation5 + $0x194] sm:$0xf0]  ;;  %v2280_v41 = vor.u32 %v3192_v36, %v2279_v63  ;;  %v3246_v17 = vld [vmem:[#allocation5 + $0x1cc] sm:$0xf]  ;;  %v2348_v36 = vor.u32 %v3206_v3, %v2345_v46 }
 0x159   :  { %1760 = vmatpush.bf16.msrb.mxu0 %v2360_v42  ;;  %v2535_v42 = vld [vmem:[#allocation5 + $0x208] sm:$0xf]  ;;  %v3256_v29 = vld [vmem:[#allocation5 + $0x214] sm:$0xf0]  ;;  %v2472_v16 = vor.u32 %v3240_v59, %v2471_v28  ;;  %v2505_v24 = vld [vmem:[#allocation5 + $0x1d8] sm:$0xf0] }
 0x15a   :  { %1788 = vmatpush.bf16.msrb.mxu2 %v2616_v35  ;;  %1722 = vmatpush.bf16.msra.mxu1 %v2676_v51  ;;  %v2695_v33 = vld [vmem:[#allocation5 + $0x348] sm:$0xf]  ;;  %v3296_v35 = vld [vmem:[#allocation5 + $0x354] sm:$0xf0]  ;;  %v2536_v8 = vor.u32 %v3256_v29, %v2535_v42  ;;  %v2508_v59 = vor.u32 %v3246_v17, %v2505_v24  ;;  %v3202_v29 = vld [vmem:[#allocation5 + $0x6c] sm:$0xf] }
 0x15b   :  { %1800 = vmatpush.bf16.msrb.mxu3 %v2776_v38  ;;  %v2903_v38 = vld [vmem:[#allocation5 + $0x4e8] sm:$0xf]  ;;  %v3348_v55 = vld [vmem:[#allocation5 + $0x4f4] sm:$0xf0]  ;;  %v2696_v51 = vor.u32 %v3296_v35, %v2695_v33  ;;  %v2329_v33 = vld [vmem:[#allocation5 + $0x78] sm:$0xf0] }
 0x15c   :  { %3048 = vmatmul.msk.bf16.vlgmr.msra.gmra.mxu3 %vm95_vm0, %v4092_v58  ;;  %v2455_v7 = vld [vmem:[#allocation5 + $0x168] sm:$0xf]  ;;  %v2904_v47 = vor.u32 %v3348_v55, %v2903_v38  ;;  %v3344_v34 = vld [vmem:[#allocation5 + $0x4d4] sm:$0xf0]  ;;  %v3242_v38 = vld [vmem:[#allocation5 + $0x1ac] sm:$0xf] }
 0x15d   :  { %1761 = vmatpush.bf16.msrb.mxu0 %v2344_v62  ;;  %v3236_v62 = vld [vmem:[#allocation5 + $0x174] sm:$0xf0]  ;;  %v2679_v25 = vld [vmem:[#allocation5 + $0x328] sm:$0xf]  ;;  %v2489_v55 = vld [vmem:[#allocation5 + $0x1b8] sm:$0xf0] }
 0x15e   :  { %1789 = vmatpush.bf16.msrb.mxu2 %v2600_v6  ;;  %1723 = vmatpush.bf16.msra.mxu1 %v2660_v52  ;;  %v3292_v6 = vld [vmem:[#allocation5 + $0x334] sm:$0xf0]  ;;  %v2456_v49 = vor.u32 %v3236_v62, %v2455_v7  ;;  %v2439_v50 = vld [vmem:[#allocation5 + $0x148] sm:$0xf]  ;;  %v2492_v7 = vor.u32 %v3242_v38, %v2489_v55  ;;  %v3346_v3 = vld [vmem:[#allocation5 + $0x4ec] sm:$0xf] }
 0x15f   :  { %1801 = vmatpush.bf16.msrb.mxu3 %v2760_v26  ;;  %v2887_v26 = vld [vmem:[#allocation5 + $0x4c8] sm:$0xf]  ;;  %v2680_v48 = vor.u32 %v3292_v6, %v2679_v25  ;;  %v3232_v52 = vld [vmem:[#allocation5 + $0x154] sm:$0xf0]  ;;  %v3238_v25 = vld [vmem:[#allocation5 + $0x18c] sm:$0xf] }
 0x160   :  { %v2663_v9 = vld [vmem:[#allocation5 + $0x308] sm:$0xf]  ;;  %v3288_v13 = vld [vmem:[#allocation5 + $0x314] sm:$0xf0]  ;;  %v2440_v14 = vor.u32 %v3232_v52, %v2439_v50  ;;  %v2473_v6 = vld [vmem:[#allocation5 + $0x198] sm:$0xf0] }
 0x161   :  { %1762 = vmatpush.bf16.msrb.mxu0 %v2328_v11  ;;  %3046 = vmatmul.msk.bf16.vlgmr.msra.gmra.mxu1 %vm95_vm0, %v4039_v31  ;;  %v2888_v11 = vor.u32 %v3344_v34, %v2887_v26  ;;  %v2664_v2 = vor.u32 %v3288_v13, %v2663_v9  ;;  %v3336_v21 = vld [vmem:[#allocation5 + $0x494] sm:$0xf0]  ;;  %v2839_v28 = vld [vmem:[#allocation5 + $0x468] sm:$0xf]  ;;  %v2476_v50 = vor.u32 %v3238_v25, %v2473_v6  ;;  %v3234_v9 = vld [vmem:[#allocation5 + $0x16c] sm:$0xf] }
 0x162   :  { %1772 = vmatpush.bf16.msrb.mxu1 %v2520_v53  ;;  %1790 = vmatpush.bf16.msrb.mxu2 %v2584_v54  ;;  %v2380_v53 = vor.u32 %v3214_v5, %v2377_v12  ;;  %v2871_v54 = vld [vmem:[#allocation5 + $0x4a8] sm:$0xf]  ;;  %v3332_v42 = vld [vmem:[#allocation5 + $0x474] sm:$0xf0]  ;;  %v2457_v13 = vld [vmem:[#allocation5 + $0x178] sm:$0xf0] }
 0x163   :  { %1802 = vmatpush.bf16.msrb.mxu3 %v2744_v56  ;;  %v3340_v56 = vld [vmem:[#allocation5 + $0x4b4] sm:$0xf0]  ;;  %v2840_v37 = vor.u32 %v3332_v42, %v2839_v28  ;;  %v2807_v12 = vld [vmem:[#allocation5 + $0x428] sm:$0xf]  ;;  %v2905_v46 = vld [vmem:[#allocation5 + $0x4f8] sm:$0xf0] }
 0x164   :  { %v2872_v1 = vor.u32 %v3340_v56, %v2871_v54  ;;  %v3328_v62 = vld [vmem:[#allocation5 + $0x454] sm:$0xf0]  ;;  %v2791_v56 = vld [vmem:[#allocation5 + $0x408] sm:$0xf]  ;;  %v2908_v28 = vor.u32 %v3346_v3, %v2905_v46  ;;  %v3342_v42 = vld [vmem:[#allocation5 + $0x4cc] sm:$0xf] }
 0x165   :  { %1763 = vmatpush.bf16.msrb.mxu0 %v2312_v10  ;;  %v2423_v10 = vld [vmem:[#allocation5 + $0x128] sm:$0xf]  ;;  %v3324_v52 = vld [vmem:[#allocation5 + $0x434] sm:$0xf0]  ;;  %v3262_v3 = vld [vmem:[#allocation5 + $0x24c] sm:$0xf] }
 0x166   :  { %1773 = vmatpush.bf16.msrb.mxu1 %v2504_v39  ;;  %1791 = vmatpush.bf16.msrb.mxu2 %v2568_v18  ;;  %v3228_v39 = vld [vmem:[#allocation5 + $0x134] sm:$0xf0]  ;;  %v2855_v18 = vld [vmem:[#allocation5 + $0x488] sm:$0xf]  ;;  %v2808_v20 = vor.u32 %v3324_v52, %v2807_v12  ;;  %v3334_v52 = vld [vmem:[#allocation5 + $0x48c] sm:$0xf] }
 0x167   :  { %1803 = vmatpush.bf16.msrb.mxu3 %v2728_v19  ;;  %v2524_v19 = vor.u32 %v3250_v30, %v2521_v45  ;;  %v2424_v61 = vor.u32 %v3228_v39, %v2423_v10  ;;  %v2856_v63 = vor.u32 %v3336_v21, %v2855_v18  ;;  %v2983_v30 = vld [vmem:[#allocation5 + $0x588] sm:$0xf]  ;;  %v3368_v45 = vld [vmem:[#allocation5 + $0x594] sm:$0xf0]  ;;  %v3190_v10 = vld [vmem:[#allocation5 + $0xc] sm:$0xf] }
 0x168   :  { %v2281_v39 = vld [vmem:[#allocation5 + $0x18] sm:$0xf0]  ;;  %v3282_v18 = vld [vmem:[#allocation5 + $0x2ec] sm:$0xf]  ;;  %v2984_v21 = vor.u32 %v3368_v45, %v2983_v30 }
 0x169   :  { %1764 = vmatpush.bf16.msrb.mxu0 %v2296_v22  ;;  %v2407_v22 = vld [vmem:[#allocation5 + $0x108] sm:$0xf]  ;;  %v2284_v17 = vor.u32 %v3190_v10, %v2281_v39  ;;  %v3314_v45 = vld [vmem:[#allocation5 + $0x3ec] sm:$0xf]  ;;  %v2841_v39 = vld [vmem:[#allocation5 + $0x478] sm:$0xf0] }
 0x16a   :  { %1774 = vmatpush.bf16.msrb.mxu1 %v2488_v23  ;;  %1792 = vmatpush.bf16.msrb.mxu2 %v2552_v27  ;;  %v3224_v23 = vld [vmem:[#allocation5 + $0x114] sm:$0xf0]  ;;  %v3031_v27 = vld [vmem:[#allocation5 + $0x5e8] sm:$0xf]  ;;  %v3330_v10 = vld [vmem:[#allocation5 + $0x46c] sm:$0xf] }
 0x16b   :  { %1804 = vmatpush.bf16.msrb.mxu3 %v2712_v0  ;;  %v3380_v0 = vld [vmem:[#allocation5 + $0x5f4] sm:$0xf0]  ;;  %v2408_v35 = vor.u32 %v3224_v23, %v2407_v22  ;;  %v2967_v23 = vld [vmem:[#allocation5 + $0x568] sm:$0xf]  ;;  %v2569_v46 = vld [vmem:[#allocation5 + $0x258] sm:$0xf0] }
 0x16c   :  { %v3032_v40 = vor.u32 %v3380_v0, %v3031_v27  ;;  %v2425_v27 = vld [vmem:[#allocation5 + $0x138] sm:$0xf0]  ;;  %v3278_v0 = vld [vmem:[#allocation5 + $0x2cc] sm:$0xf] }
 0x16d   :  { %1765 = vmatpush.bf16.msrb.mxu0 %v2280_v41  ;;  %v2332_v41 = vor.u32 %v3202_v29, %v2329_v33  ;;  %v2889_v29 = vld [vmem:[#allocation5 + $0x4d8] sm:$0xf0] }
 0x16e   :  { %1775 = vmatpush.bf16.msrb.mxu1 %v2472_v16  ;;  %1793 = vmatpush.bf16.msrb.mxu2 %v2536_v8  ;;  %v2823_v16 = vld [vmem:[#allocation5 + $0x448] sm:$0xf] }
 0x16f   :  { %1805 = vmatpush.bf16.msrb.mxu3 %v2696_v51  ;;  %v3015_v8 = vld [vmem:[#allocation5 + $0x5c8] sm:$0xf]  ;;  %v3376_v51 = vld [vmem:[#allocation5 + $0x5d4] sm:$0xf0]  ;;  %v2824_v34 = vor.u32 %v3328_v62, %v2823_v16  ;;  %v2892_v16 = vor.u32 %v3342_v42, %v2889_v29  ;;  %v2873_v62 = vld [vmem:[#allocation5 + $0x4b8] sm:$0xf0] }
 0x170   :  { %3049 = vmatmul.msk.bf16.vlgmr.msrb.gmra.mxu0 %vm95_vm0, %v3977_v44  ;;  %v3016_v26 = vor.u32 %v3376_v51, %v3015_v8  ;;  %v3274_v8 = vld [vmem:[#allocation5 + $0x2ac] sm:$0xf]  ;;  %v2617_v51 = vld [vmem:[#allocation5 + $0x2b8] sm:$0xf0] }
 0x171   :  { %1814 = vmatpush.bf16.msra.mxu0 %v2904_v47  ;;  %3051 = vmatmul.msk.bf16.vlgmr.msrb.gmra.mxu2 %vm95_vm0, %v3990_v43  ;;  %v3198_v47 = vld [vmem:[#allocation5 + $0x4c] sm:$0xf] }
 0x172   :  { %1842 = vmatpush.bf16.msra.mxu2 %v2396_v60  ;;  %1776 = vmatpush.bf16.msrb.mxu1 %v2456_v49  ;;  %v2313_v60 = vld [vmem:[#allocation5 + $0x58] sm:$0xf0]  ;;  %v2999_v49 = vld [vmem:[#allocation5 + $0x5a8] sm:$0xf] }
 0x173   :  { %1806 = vmatpush.bf16.msrb.mxu3 %v2680_v48  ;;  %v2316_v5 = vor.u32 %v3198_v47, %v2313_v60  ;;  %v3372_v48 = vld [vmem:[#allocation5 + $0x5b4] sm:$0xf0]  ;;  %v3378_v47 = vld [vmem:[#allocation5 + $0x5ec] sm:$0xf]  ;;  %v3033_v60 = vld [vmem:[#allocation5 + $0x5f8] sm:$0xf0] }
 0x174   :  { %v3000_v54 = vor.u32 %v3372_v48, %v2999_v49  ;;  %v3036_v49 = vor.u32 %v3378_v47, %v3033_v60  ;;  %v3270_v48 = vld [vmem:[#allocation5 + $0x28c] sm:$0xf]  ;;  %v2729_v60 = vld [vmem:[#allocation5 + $0x398] sm:$0xf0] }
 0x175   :  { %1815 = vmatpush.bf16.msra.mxu0 %v2888_v11  ;;  %v3194_v11 = vld [vmem:[#allocation5 + $0x2c] sm:$0xf] }
 0x176   :  { %1843 = vmatpush.bf16.msra.mxu2 %v2380_v53  ;;  %1777 = vmatpush.bf16.msrb.mxu1 %v2440_v14  ;;  %v2297_v53 = vld [vmem:[#allocation5 + $0x38] sm:$0xf0]  ;;  %v3320_v14 = vld [vmem:[#allocation5 + $0x414] sm:$0xf0]  ;;  %v3302_v47 = vld [vmem:[#allocation5 + $0x38c] sm:$0xf] }
 0x177   :  { %1807 = vmatpush.bf16.msrb.mxu3 %v2664_v2  ;;  %v2300_v32 = vor.u32 %v3194_v11, %v2297_v53  ;;  %v2460_v2 = vor.u32 %v3234_v9, %v2457_v13  ;;  %v2857_v11 = vld [vmem:[#allocation5 + $0x498] sm:$0xf0]  ;;  %v3374_v53 = vld [vmem:[#allocation5 + $0x5cc] sm:$0xf]  ;;  %v2919_v13 = vld [vmem:[#allocation5 + $0x508] sm:$0xf] }
 0x179   :  { %1816 = vmatpush.bf16.msra.mxu0 %v2872_v1  ;;  %v3230_v1 = vld [vmem:[#allocation5 + $0x14c] sm:$0xf] }
 0x17a   :  { %1844 = vmatpush.bf16.msra.mxu2 %v2364_v57  ;;  %3052 = vmatmul.msk.bf16.vlgmr.msrb.gmra.mxu3 %vm95_vm0, %v4039_v31  ;;  %v2441_v57 = vld [vmem:[#allocation5 + $0x158] sm:$0xf0] }
 0x17b   :  { %1856 = vmatpush.bf16.msra.mxu3 %v2524_v19  ;;  %1778 = vmatpush.bf16.msrb.mxu1 %v2424_v61  ;;  %v2649_v19 = vld [vmem:[#allocation5 + $0x2f8] sm:$0xf0]  ;;  %v2792_v61 = vor.u32 %v3320_v14, %v2791_v56  ;;  %v2444_v24 = vor.u32 %v3230_v1, %v2441_v57  ;;  %v3352_v56 = vld [vmem:[#allocation5 + $0x514] sm:$0xf0]  ;;  %v2860_v14 = vor.u32 %v3334_v52, %v2857_v11  ;;  %v3370_v1 = vld [vmem:[#allocation5 + $0x5ac] sm:$0xf] }
 0x17c   :  { %v2652_v22 = vor.u32 %v3282_v18, %v2649_v19  ;;  %v3001_v57 = vld [vmem:[#allocation5 + $0x5b8] sm:$0xf0]  ;;  %v2920_v18 = vor.u32 %v3352_v56, %v2919_v13  ;;  %v3354_v11 = vld [vmem:[#allocation5 + $0x52c] sm:$0xf] }
 0x17d   :  { %1817 = vmatpush.bf16.msra.mxu0 %v2856_v63  ;;  %v3364_v63 = vld [vmem:[#allocation5 + $0x574] sm:$0xf0]  ;;  %v2713_v52 = vld [vmem:[#allocation5 + $0x378] sm:$0xf0] }
 0x17e   :  { %1845 = vmatpush.bf16.msra.mxu2 %v2348_v36  ;;  %v3226_v36 = vld [vmem:[#allocation5 + $0x12c] sm:$0xf]  ;;  %v2968_v33 = vor.u32 %v3364_v63, %v2967_v23  ;;  %v2825_v63 = vld [vmem:[#allocation5 + $0x458] sm:$0xf0] }
 0x17f   :  { %1857 = vmatpush.bf16.msra.mxu3 %v2508_v59  ;;  %1779 = vmatpush.bf16.msrb.mxu1 %v2408_v35  ;;  %v2633_v59 = vld [vmem:[#allocation5 + $0x2d8] sm:$0xf0]  ;;  %v2951_v35 = vld [vmem:[#allocation5 + $0x548] sm:$0xf]  ;;  %v2428_v38 = vor.u32 %v3226_v36, %v2425_v27  ;;  %v3326_v23 = vld [vmem:[#allocation5 + $0x44c] sm:$0xf] }
 0x180   :  { %v2636_v55 = vor.u32 %v3278_v0, %v2633_v59  ;;  %v3366_v36 = vld [vmem:[#allocation5 + $0x58c] sm:$0xf]  ;;  %v2553_v59 = vld [vmem:[#allocation5 + $0x238] sm:$0xf0]  ;;  %v2828_v42 = vor.u32 %v3326_v23, %v2825_v63 }
 0x181   :  { %1818 = vmatpush.bf16.msra.mxu0 %v2840_v37  ;;  %v3222_v37 = vld [vmem:[#allocation5 + $0x10c] sm:$0xf]  ;;  %v2697_v56 = vld [vmem:[#allocation5 + $0x358] sm:$0xf0] }
 0x182   :  { %1846 = vmatpush.bf16.msra.mxu2 %v2332_v41  ;;  %3050 = vmatmul.msk.bf16.vlgmr.msrb.gmra.mxu1 %vm95_vm0, %v4074_v15  ;;  %v2409_v41 = vld [vmem:[#allocation5 + $0x118] sm:$0xf0]  ;;  %v3258_v0 = vld [vmem:[#allocation5 + $0x22c] sm:$0xf] }
 0x183   :  { %1828 = vmatpush.bf16.msra.mxu1 %v3032_v40  ;;  %1858 = vmatpush.bf16.msra.mxu3 %v2492_v7  ;;  %v3360_v40 = vld [vmem:[#allocation5 + $0x554] sm:$0xf0]  ;;  %v3338_v7 = vld [vmem:[#allocation5 + $0x4ac] sm:$0xf]  ;;  %v2412_v6 = vor.u32 %v3222_v37, %v2409_v41  ;;  %v2969_v37 = vld [vmem:[#allocation5 + $0x578] sm:$0xf0]  ;;  %v2556_v41 = vor.u32 %v3258_v0, %v2553_v59 }
 0x184   :  { %v2952_v25 = vor.u32 %v3360_v40, %v2951_v35  ;;  %v2876_v12 = vor.u32 %v3338_v7, %v2873_v62  ;;  %v2745_v35 = vld [vmem:[#allocation5 + $0x3b8] sm:$0xf0]  ;;  %v3362_v40 = vld [vmem:[#allocation5 + $0x56c] sm:$0xf] }
 0x185   :  { %1819 = vmatpush.bf16.msra.mxu0 %v2824_v34  ;;  %v2935_v34 = vld [vmem:[#allocation5 + $0x528] sm:$0xf]  ;;  %v2972_v62 = vor.u32 %v3362_v40, %v2969_v37  ;;  %v3394_v23 = vld [vmem:[#allocation8 + $0x68] sm:$0xff] }
 0x186   :  { %1847 = vmatpush.bf16.msra.mxu2 %v2316_v5  ;;  %v3356_v5 = vld [vmem:[#allocation5 + $0x534] sm:$0xf0] }
 0x187   :  { %1829 = vmatpush.bf16.msra.mxu1 %v3016_v26  ;;  %1859 = vmatpush.bf16.msra.mxu3 %v2476_v50  ;;  %v2620_v26 = vor.u32 %v3274_v8, %v2617_v51  ;;  %v2601_v50 = vld [vmem:[#allocation5 + $0x298] sm:$0xf0]  ;;  %v2936_v9 = vor.u32 %v3356_v5, %v2935_v34  ;;  %v3254_v8 = vld [vmem:[#allocation5 + $0x20c] sm:$0xf] }
 0x188   :  { %v2537_v51 = vld [vmem:[#allocation5 + $0x218] sm:$0xf0] }
 0x189   :  { %1820 = vmatpush.bf16.msra.mxu0 %v2808_v20  ;;  %v3266_v20 = vld [vmem:[#allocation5 + $0x26c] sm:$0xf]  ;;  %v2953_v34 = vld [vmem:[#allocation5 + $0x558] sm:$0xf0]  ;;  %v2540_v5 = vor.u32 %v3254_v8, %v2537_v51 }
 0x18a   :  { %1848 = vmatpush.bf16.msra.mxu2 %v2300_v32  ;;  %v2585_v32 = vld [vmem:[#allocation5 + $0x278] sm:$0xf0] }
 0x18b   :  { %1830 = vmatpush.bf16.msra.mxu1 %v3000_v54  ;;  %1860 = vmatpush.bf16.msra.mxu3 %v2460_v2  ;;  %v2604_v54 = vor.u32 %v3270_v48, %v2601_v50  ;;  %v2777_v2 = vld [vmem:[#allocation5 + $0x3f8] sm:$0xf0]  ;;  %v2588_v19 = vor.u32 %v3266_v20, %v2585_v32  ;;  %v3298_v50 = vld [vmem:[#allocation5 + $0x36c] sm:$0xf] }
 0x18c   :  { %v3350_v20 = vld [vmem:[#allocation5 + $0x50c] sm:$0xf]  ;;  %v2921_v32 = vld [vmem:[#allocation5 + $0x518] sm:$0xf0] }
 0x18d   :  { %1821 = vmatpush.bf16.msra.mxu0 %v2792_v61  ;;  %v2844_v61 = vor.u32 %v3330_v10, %v2841_v39  ;;  %v2681_v10 = vld [vmem:[#allocation5 + $0x338] sm:$0xf0]  ;;  %v3386_v39 = vld [vmem:[#allocation8 + $0x28] sm:$0xff] }
 0x18e   :  { %1849 = vmatpush.bf16.msra.mxu2 %v2284_v17  ;;  %v3004_v17 = vor.u32 %v3370_v1, %v3001_v57  ;;  %v3286_v57 = vld [vmem:[#allocation5 + $0x30c] sm:$0xf] }
 0x18f   :  { %1831 = vmatpush.bf16.msra.mxu1 %v2984_v21  ;;  %1861 = vmatpush.bf16.msra.mxu3 %v2444_v24  ;;  %v2780_v21 = vor.u32 %v3314_v45, %v2777_v2  ;;  %v3310_v24 = vld [vmem:[#allocation5 + $0x3cc] sm:$0xf]  ;;  %v2924_v45 = vor.u32 %v3350_v20, %v2921_v32 }
 0x190   :  { %3053 = vmatmul.msk.bf16.vlgmr.msra.gmra.mxu0 %vm95_vm0, %v4064_v4  ;;  %v3290_v2 = vld [vmem:[#allocation5 + $0x32c] sm:$0xf] }
 0x191   :  { %1870 = vmatpush.bf16.msrb.mxu0 %v2652_v22  ;;  %3055 = vmatmul.msk.bf16.vlgmr.msra.gmra.mxu2 %vm95_vm0, %v3977_v44  ;;  %v3017_v44 = vld [vmem:[#allocation5 + $0x5d8] sm:$0xf0]  ;;  %v2684_v1 = vor.u32 %v3290_v2, %v2681_v10 }
 0x192   :  { %1898 = vmatpush.bf16.msrb.mxu2 %v2908_v28  ;;  %v3020_v30 = vor.u32 %v3374_v53, %v3017_v44  ;;  %v2761_v22 = vld [vmem:[#allocation5 + $0x3d8] sm:$0xf0] }
 0x193   :  { %1832 = vmatpush.bf16.msra.mxu1 %v2968_v33  ;;  %1862 = vmatpush.bf16.msra.mxu3 %v2428_v38  ;;  %v2985_v28 = vld [vmem:[#allocation5 + $0x598] sm:$0xf0]  ;;  %v2764_v27 = vor.u32 %v3310_v24, %v2761_v22  ;;  %v3306_v33 = vld [vmem:[#allocation5 + $0x3ac] sm:$0xf] }
 0x194   :  { %v2988_v29 = vor.u32 %v3366_v36, %v2985_v28  ;;  %v3322_v38 = vld [vmem:[#allocation5 + $0x42c] sm:$0xf]  ;;  %v2937_v53 = vld [vmem:[#allocation5 + $0x538] sm:$0xf0]  ;;  %v4128_v36 = vld [vmem:[#allocation7] sm:$0xf] }
 0x195   :  { %1871 = vmatpush.bf16.msrb.mxu0 %v2636_v55  ;;  %v2809_v55 = vld [vmem:[#allocation5 + $0x438] sm:$0xf0]  ;;  %v2940_v13 = vor.u32 %v3354_v11, %v2937_v53  ;;  %v3393_v28 = vld [vmem:[#allocation8 + $0x60] sm:$0xff]  ;;  %v622_v0 = vperm.slane %v4128_v36, 0 }
 0x196   :  { %1899 = vmatpush.bf16.msrb.mxu2 %v2892_v16  ;;  %v2748_v16 = vor.u32 %v3306_v33, %v2745_v35  ;;  %v2812_v7 = vor.u32 %v3322_v38, %v2809_v55  ;;  %v3388_v44 = vld [vmem:[#allocation8 + $0x38] sm:$0xff]  ;;  %v3391_v38 = vld [vmem:[#allocation8 + $0x50] sm:$0xff] }
 0x197   :  { %1833 = vmatpush.bf16.msra.mxu1 %v2952_v25  ;;  %1863 = vmatpush.bf16.msra.mxu3 %v2412_v6  ;;  %v3318_v25 = vld [vmem:[#allocation5 + $0x40c] sm:$0xf]  ;;  %v2793_v6 = vld [vmem:[#allocation5 + $0x418] sm:$0xf0] }
 0x198   :  { %v3404_v10 = vld [vmem:[#allocation8 + $0xb8] sm:$0xff] }
 0x199   :  { %1872 = vmatpush.bf16.msrb.mxu0 %v2620_v26  ;;  %v3358_v26 = vld [vmem:[#allocation5 + $0x54c] sm:$0xf] }
 0x19a   :  { %1900 = vmatpush.bf16.msrb.mxu2 %v2876_v12  ;;  %3056 = vmatmul.msk.bf16.vlgmr.msra.gmra.mxu3 %vm95_vm0, %v4074_v15  ;;  %v2572_v15 = vor.u32 %v3262_v3, %v2569_v46  ;;  %v2732_v12 = vor.u32 %v3302_v47, %v2729_v60  ;;  %v2956_v48 = vor.u32 %v3358_v26, %v2953_v34  ;;  %v3384_v3 = vld [vmem:[#allocation8 + $0x18] sm:$0xff]  ;;  %v3389_v47 = vld [vmem:[#allocation8 + $0x40] sm:$0xff] }
 0x19b   :  { %1912 = vmatpush.bf16.msrb.mxu3 %v3036_v49  ;;  %1834 = vmatpush.bf16.msra.mxu1 %v2936_v9  ;;  %v2796_v49 = vor.u32 %v3318_v25, %v2793_v6  ;;  %v2716_v9 = vor.u32 %v3298_v50, %v2713_v52  ;;  %v623_v50 = vperm.slane %v4128_v36, 1 }
 0x19d   :  { %1873 = vmatpush.bf16.msrb.mxu0 %v2604_v54  ;;  %v3294_v54 = vld [vmem:[#allocation5 + $0x34c] sm:$0xf] }
 0x19e   :  { %1901 = vmatpush.bf16.msrb.mxu2 %v2860_v14  ;;  %v3387_v14 = vld [vmem:[#allocation8 + $0x30] sm:$0xff] }
 0x19f   :  { %1913 = vmatpush.bf16.msrb.mxu3 %v3020_v30  ;;  %1835 = vmatpush.bf16.msra.mxu1 %v2920_v18  ;;  %v2700_v30 = vor.u32 %v3294_v54, %v2697_v56  ;;  %v2665_v18 = vld [vmem:[#allocation5 + $0x318] sm:$0xf0] }
 0x1a1   :  { %1874 = vmatpush.bf16.msrb.mxu0 %v2588_v19 }
 0x1a2   :  { %1902 = vmatpush.bf16.msrb.mxu2 %v2844_v61  ;;  %3054 = vmatmul.msk.bf16.vlgmr.msra.gmra.mxu1 %vm95_vm0, %v4092_v58  ;;  %v3395_v61 = vld [vmem:[#allocation8 + $0x70] sm:$0xff] }
 0x1a3   :  { %1884 = vmatpush.bf16.msrb.mxu1 %v2780_v21  ;;  %1914 = vmatpush.bf16.msrb.mxu3 %v3004_v17  ;;  %v3385_v21 = vld [vmem:[#allocation8 + $0x20] sm:$0xff]  ;;  %v3383_v17 = vld [vmem:[#allocation8 + $0x10] sm:$0xff] }
 0x1a5   :  { %1875 = vmatpush.bf16.msrb.mxu0 %v2572_v15 }
 0x1a6   :  { %1903 = vmatpush.bf16.msrb.mxu2 %v2828_v42  ;;  %v3392_v42 = vld [vmem:[#allocation8 + $0x58] sm:$0xff] }
 0x1a7   :  { %1885 = vmatpush.bf16.msrb.mxu1 %v2764_v27  ;;  %1915 = vmatpush.bf16.msrb.mxu3 %v2988_v29  ;;  %v3381_v27 = vld [vmem:[#allocation8] sm:$0xff] }
 0x1a9   :  { %1876 = vmatpush.bf16.msrb.mxu0 %v2556_v41 }
 0x1aa   :  { %1904 = vmatpush.bf16.msrb.mxu2 %v2812_v7  ;;  %v3390_v7 = vld [vmem:[#allocation8 + $0x48] sm:$0xff] }
 0x1ab   :  { %1886 = vmatpush.bf16.msrb.mxu1 %v2748_v16  ;;  %1916 = vmatpush.bf16.msrb.mxu3 %v2972_v62 }
 0x1ad   :  { %1877 = vmatpush.bf16.msrb.mxu0 %v2540_v5  ;;  %v1599_v19 = vpop.f32.mrf.mxu0 }
 0x1ae   :  { %1905 = vmatpush.bf16.msrb.mxu2 %v2796_v49  ;;  %v1600_v33 = vadd.f32 %v1599_v19, %v622_v0 }
 0x1af   :  { %1887 = vmatpush.bf16.msrb.mxu1 %v2732_v12  ;;  %1917 = vmatpush.bf16.msrb.mxu3 %v2956_v48 }
 0x1b0   :  { %3057 = vmatmul.msk.bf16.vlgmr.msrb.gmra.mxu0 %vm95_vm0, %v3990_v43  ;;  %v2668_v43 = vor.u32 %v3286_v57, %v2665_v18 }
 0x1b1   :  { %2190 = vmatpush.bf16.msra.mxu0 %v3388_v44  ;;  %3059 = vmatmul.msk.bf16.vlgmr.msrb.gmra.mxu2 %vm95_vm0, %v4064_v4  ;;  %v3396_v4 = vld [vmem:[#allocation8 + $0x78] sm:$0xff] }
 0x1b2   :  { %2218 = vmatpush.bf16.msra.mxu2 %v3404_v10 }
 0x1b3   :  { %1888 = vmatpush.bf16.msrb.mxu1 %v2716_v9  ;;  %1918 = vmatpush.bf16.msrb.mxu3 %v2940_v13 }
 0x1b4   :  { %v1627_v46 = vpop.f32.mrf.mxu2 }
 0x1b5   :  { %2191 = vmatpush.bf16.msra.mxu0 %v3387_v14  ;;  %v1601_v24 = vpop.f32.mrf.mxu0 }
 0x1b6   :  { %v1602_v35 = vadd.f32 %v1601_v24, %v622_v0  ;;  %v3399_v24 = vld [vmem:[#allocation8 + $0x90] sm:$0xff] }
 0x1b7   :  { %1889 = vmatpush.bf16.msrb.mxu1 %v2700_v30  ;;  %1919 = vmatpush.bf16.msrb.mxu3 %v2924_v45 }
 0x1b9   :  { %2192 = vmatpush.bf16.msra.mxu0 %v3386_v39 }
 0x1ba   :  { %3060 = vmatmul.msk.bf16.vlgmr.msrb.gmra.mxu3 %vm95_vm0, %v4092_v58  ;;  %v3382_v58 = vld [vmem:[#allocation8 + $0x8] sm:$0xff] }
 0x1bb   :  { %1890 = vmatpush.bf16.msrb.mxu1 %v2684_v1  ;;  %v1641_v22 = vpop.f32.mrf.mxu3 }
 0x1bc   :  { %v1629_v15 = vpop.f32.mrf.mxu2 }
 0x1bd   :  { %2193 = vmatpush.bf16.msra.mxu0 %v3385_v21  ;;  %v1613_v63 = vpop.f32.mrf.mxu1  ;;  %v3403_v21 = vld [vmem:[#allocation8 + $0xb0] sm:$0xff] }
 0x1be   :  { %v1614_v55 = vadd.f32 %v1613_v63, %v1600_v33  ;;  %2219 = vmatpush.bf16.msra.mxu2 %v3403_v21 }
 0x1bf   :  { %1891 = vmatpush.bf16.msrb.mxu1 %v2668_v43 }
 0x1c0   :  { %v1628_v41 = vadd.f32 %v1627_v46, %v1614_v55  ;;  %v3402_v46 = vld [vmem:[#allocation8 + $0xa8] sm:$0xff]  ;;  %v3409_v55 = vld [vmem:[#allocation8 + $0xe0] sm:$0xff] }
 0x1c1   :  { %2194 = vmatpush.bf16.msra.mxu0 %v3384_v3 }
 0x1c2   :  { %3058 = vmatmul.msk.bf16.vlgmr.msrb.gmra.mxu1 %vm95_vm0, %v4039_v31  ;;  %v1655_v31 = vpop.f32.mrf.mxu0  ;;  %v1642_v60 = vadd.f32 %v1641_v22, %v1628_v41  ;;  %2220 = vmatpush.bf16.msra.mxu2 %v3402_v46 }
 0x1c3   :  { %2204 = vmatpush.bf16.msra.mxu1 %v3396_v4  ;;  %v1643_v59 = vpop.f32.mrf.mxu3 }
 0x1c4   :  { %v1683_v37 = vpop.f32.mrf.mxu2  ;;  %v1656_v6 = vadd.f32 %v1655_v31, %v1642_v60  ;;  %v3407_v60 = vld [vmem:[#allocation8 + $0xd0] sm:$0xff] }
 0x1c5   :  { %2195 = vmatpush.bf16.msra.mxu0 %v3383_v17  ;;  %v1615_v29 = vpop.f32.mrf.mxu1  ;;  %v1684_v53 = vadd.f32 %v1683_v37, %v623_v50  ;;  %v3400_v17 = vld [vmem:[#allocation8 + $0x98] sm:$0xff] }
 0x1c6   :  { %v1616_v40 = vadd.f32 %v1615_v29, %v1602_v35 }
 0x1c7   :  { %2205 = vmatpush.bf16.msra.mxu1 %v3395_v61  ;;  %v3401_v61 = vld [vmem:[#allocation8 + $0xa0] sm:$0xff] }
 0x1c8   :  { %v1630_v16 = vadd.f32 %v1629_v15, %v1616_v40  ;;  %2221 = vmatpush.bf16.msra.mxu2 %v3401_v61 }
 0x1c9   :  { %2196 = vmatpush.bf16.msra.mxu0 %v3382_v58  ;;  %v3397_v58 = vld [vmem:[#allocation8 + $0x80] sm:$0xff] }
 0x1ca   :  { %v1657_v62 = vpop.f32.mrf.mxu0  ;;  %v1644_v25 = vadd.f32 %v1643_v59, %v1630_v16  ;;  %v3410_v59 = vld [vmem:[#allocation8 + $0xe8] sm:$0xff] }
 0x1cb   :  { %2206 = vmatpush.bf16.msra.mxu1 %v3394_v23  ;;  %v1697_v8 = vpop.f32.mrf.mxu3  ;;  %v3398_v23 = vld [vmem:[#allocation8 + $0x88] sm:$0xff] }
 0x1cc   :  { %v1658_v26 = vadd.f32 %v1657_v62, %v1644_v25  ;;  %v1685_v34 = vpop.f32.mrf.mxu2  ;;  %v1698_v44 = vadd.f32 %v1697_v8, %v1684_v53  ;;  %2222 = vmatpush.bf16.msra.mxu2 %v3400_v17 }
 0x1cd   :  { %2197 = vmatpush.bf16.msra.mxu0 %v3381_v27  ;;  %v1669_v51 = vpop.f32.mrf.mxu1  ;;  %v1686_v54 = vadd.f32 %v1685_v34, %v623_v50  ;;  %v3411_v27 = vld [vmem:[#allocation8 + $0xf0] sm:$0xff] }
 0x1ce   :  { %v1670_v12 = vadd.f32 %v1669_v51, %v1656_v6 }
 0x1cf   :  { %2207 = vmatpush.bf16.msra.mxu1 %v3393_v28  ;;  %v3412_v28 = vld [vmem:[#allocation8 + $0xf8] sm:$0xff] }
 0x1d0   :  { %2223 = vmatpush.bf16.msra.mxu2 %v3399_v24  ;;  %2232 = vmatpush.bf16.msra.mxu3 %v3412_v28  ;;  %v3425_v24 = vld [vmem:[%s4147_s4] ss:$0 sm:$0xff] }
 0x1d2   :  { %v1711_v52 = vpop.f32.mrf.mxu0 }
 0x1d3   :  { %2208 = vmatpush.bf16.msra.mxu1 %v3392_v42  ;;  %v1699_v49 = vpop.f32.mrf.mxu3  ;;  %v1712_v20 = vadd.f32 %v1711_v52, %v1698_v44  ;;  %v624_v42 = vperm.slane %v4128_v36, 2 }
 0x1d4   :  { %v1739_v9 = vpop.f32.mrf.mxu2  ;;  %v1700_v32 = vadd.f32 %v1699_v49, %v1686_v54  ;;  %2224 = vmatpush.bf16.msra.mxu2 %v3398_v23  ;;  %2233 = vmatpush.bf16.msra.mxu3 %v3411_v27  ;;  %v625_v54 = vperm.slane %v4128_v36, 3 }
 0x1d5   :  { %v1671_v5 = vpop.f32.mrf.mxu1 }
 0x1d6   :  { %v1672_v48 = vadd.f32 %v1671_v5, %v1658_v26 }
 0x1d7   :  { %2209 = vmatpush.bf16.msra.mxu1 %v3391_v38 }
 0x1d8   :  { %v1926_v11 = vpack.c.bf16 %v1672_v48, %v1670_v12  ;;  %2225 = vmatpush.bf16.msra.mxu2 %v3397_v58  ;;  %2234 = vmatpush.bf16.msra.mxu3 %v3410_v59  ;;  %v3406_v48 = vld [vmem:[#allocation8 + $0xc8] sm:$0xff] }
 0x1da   :  { %2198 = vmatmul.bf16.vlgmr.msra.gmra.mxu0 %v1926_v11  ;;  %v1713_v14 = vpop.f32.mrf.mxu0  ;;  %v3405_v11 = vld [vmem:[#allocation8 + $0xc0] sm:$0xff] }
 0x1db   :  { %2210 = vmatpush.bf16.msra.mxu1 %v3390_v7  ;;  %v1714_v45 = vadd.f32 %v1713_v14, %v1700_v32  ;;  %v3408_v7 = vld [vmem:[#allocation8 + $0xd8] sm:$0xff] }
 0x1dc   :  { %v1741_v57 = vpop.f32.mrf.mxu2  ;;  %2235 = vmatpush.bf16.msra.mxu3 %v3409_v55 }
 0x1de   :  { %v1725_v13 = vpop.f32.mrf.mxu1 }
 0x1df   :  { %2211 = vmatpush.bf16.msra.mxu1 %v3389_v47  ;;  %v1753_v56 = vpop.f32.mrf.mxu3  ;;  %v1726_v30 = vadd.f32 %v1725_v13, %v1712_v20 }
 0x1e0   :  { %2236 = vmatpush.bf16.msra.mxu3 %v3408_v7 }
 0x1e1   :  { %v1740_v39 = vadd.f32 %v1739_v9, %v1726_v30 }
 0x1e3   :  { %v1754_v43 = vadd.f32 %v1753_v56, %v1740_v39 }
 0x1e4   :  { %2237 = vmatpush.bf16.msra.mxu3 %v3407_v60 }
 0x1e6   :  { %v1727_v2 = vpop.f32.mrf.mxu1 }
 0x1e7   :  { %v1728_v1 = vadd.f32 %v1727_v2, %v1714_v45  ;;  %v1755_v19 = vpop.f32.mrf.mxu3 }
 0x1e8   :  { %2238 = vmatpush.bf16.msra.mxu3 %v3406_v48 }
 0x1e9   :  { %v1742_v18 = vadd.f32 %v1741_v57, %v1728_v1 }
 0x1eb   :  { %v1756_v4 = vadd.f32 %v1755_v19, %v1742_v18 }
 0x1ec   :  { %2239 = vmatpush.bf16.msra.mxu3 %v3405_v11 }
 0x1ed   :  { %v1927_v3 = vpack.c.bf16 %v1756_v4, %v1754_v43  ;;  %v1767_v22 = vpop.f32.mrf.mxu0 }
 0x1ee   :  { %v1768_v35 = vadd.f32 %v1767_v22, %v624_v42 }
 0x1ef   :  { %2212 = vmatmul.bf16.vlgmr.msra.gmra.mxu1 %v1927_v3 }
 0x1f4   :  { %v1795_v0 = vpop.f32.mrf.mxu2 }
 0x1f5   :  { %v1769_v15 = vpop.f32.mrf.mxu0 }
 0x1f6   :  { %v1770_v38 = vadd.f32 %v1769_v15, %v624_v42 }
 0x1fc   :  { %v1797_v41 = vpop.f32.mrf.mxu2 }
 0x1fd   :  { %v1809_v29 = vpop.f32.mrf.mxu3 }
 0x1ff   :  { %v1781_v63 = vpop.f32.mrf.mxu1 }
 0x200   :  { %v1782_v40 = vadd.f32 %v1781_v63, %v1768_v35 }
 0x202   :  { %v1796_v8 = vadd.f32 %v1795_v0, %v1782_v40 }
 0x204   :  { %v1810_v25 = vadd.f32 %v1809_v29, %v1796_v8 }
 0x205   :  { %v1811_v62 = vpop.f32.mrf.mxu3 }
 0x207   :  { %v1783_v31 = vpop.f32.mrf.mxu1 }
 0x208   :  { %v1784_v37 = vadd.f32 %v1783_v31, %v1770_v38 }
 0x20a   :  { %v1798_v51 = vadd.f32 %v1797_v41, %v1784_v37 }
 0x20c   :  { %v1812_v6 = vadd.f32 %v1811_v62, %v1798_v51 }
 0x20d   :  { %v1823_v33 = vpop.f32.mrf.mxu0 }
 0x20e   :  { %v1824_v26 = vadd.f32 %v1823_v33, %v1810_v25 }
 0x214   :  { %v1851_v50 = vpop.f32.mrf.mxu2 }
 0x215   :  { %v1825_v47 = vpop.f32.mrf.mxu0  ;;  %v1852_v56 = vadd.f32 %v1851_v50, %v625_v54 }
 0x216   :  { %v1826_v34 = vadd.f32 %v1825_v47, %v1812_v6 }
 0x21c   :  { %v1853_v44 = vpop.f32.mrf.mxu2 }
 0x21d   :  { %v1865_v53 = vpop.f32.mrf.mxu3  ;;  %v1854_v45 = vadd.f32 %v1853_v44, %v625_v54 }
 0x21e   :  { %v1866_v14 = vadd.f32 %v1865_v53, %v1852_v56 }
 0x21f   :  { %v1837_v16 = vpop.f32.mrf.mxu1 }
 0x220   :  { %v1838_v12 = vadd.f32 %v1837_v16, %v1824_v26 }
 0x225   :  { %v1867_v9 = vpop.f32.mrf.mxu3 }
 0x226   :  { %v1868_v39 = vadd.f32 %v1867_v9, %v1854_v45 }
 0x227   :  { %v1839_v5 = vpop.f32.mrf.mxu1 }
 0x228   :  { %v1840_v49 = vadd.f32 %v1839_v5, %v1826_v34 }
 0x22a   :  { %v1928_v52 = vpack.c.bf16 %v1840_v49, %v1838_v12 }
 0x22c   :  { %2226 = vmatmul.bf16.vlgmr.msra.gmra.mxu2 %v1928_v52 }
 0x22d   :  { %v1879_v13 = vpop.f32.mrf.mxu0 }
 0x22e   :  { %v1880_v2 = vadd.f32 %v1879_v13, %v1866_v14 }
 0x234   :  { %v1907_v20 = vpop.f32.mrf.mxu2 }
 0x235   :  { %v1881_v10 = vpop.f32.mrf.mxu0 }
 0x236   :  { %v1882_v57 = vadd.f32 %v1881_v10, %v1868_v39 }
 0x23c   :  { %v1909_v43 = vpop.f32.mrf.mxu2 }
 0x23d   :  { %v1921_v30 = vpop.f32.mrf.mxu3 }
 0x23f   :  { %v1893_v32 = vpop.f32.mrf.mxu1 }
 0x240   :  { %v1894_v1 = vadd.f32 %v1893_v32, %v1880_v2 }
 0x242   :  { %v1908_v19 = vadd.f32 %v1907_v20, %v1894_v1 }
 0x244   :  { %v1922_v46 = vadd.f32 %v1921_v30, %v1908_v19 }
 0x245   :  { %v1923_v3 = vpop.f32.mrf.mxu3 }
 0x247   :  { %v1895_v18 = vpop.f32.mrf.mxu1 }
 0x248   :  { %v1896_v21 = vadd.f32 %v1895_v18, %v1882_v57 }
 0x24a   :  { %v1910_v4 = vadd.f32 %v1909_v43, %v1896_v21 }
 0x24c   :  { %v1924_v61 = vadd.f32 %v1923_v3, %v1910_v4 }
 0x24e   :  { %v1929_v36 = vpack.c.bf16 %v1924_v61, %v1922_v46 }
 0x250   :  { %2240 = vmatmul.bf16.vlgmr.msra.gmra.mxu3 %v1929_v36 }
 0x257   :  { %v2199_v17 = vpop.f32.mrf.mxu0 }
 0x258   :  { %v2200_v58 = vadd.f32 %v3425_v24, %v2199_v17 }
 0x25f   :  { %v2201_v15 = vpop.f32.mrf.mxu0 }
 0x260   :  { %v2202_v42 = vadd.f32 %v3425_v24, %v2201_v15 }
 0x26c   :  { %v2213_v22 = vpop.f32.mrf.mxu1 }
 0x26d   :  { %v2214_v63 = vadd.f32 %v2213_v22, %v2200_v58 }
 0x274   :  { %v2215_v59 = vpop.f32.mrf.mxu1 }
 0x275   :  { %v2216_v29 = vadd.f32 %v2215_v59, %v2202_v42 }
 0x2af   :  { %v2227_v23 = vpop.f32.mrf.mxu2 }
 0x2b0   :  { %v2228_v28 = vadd.f32 %v2227_v23, %v2214_v63 }
 0x2b7   :  { %v2229_v31 = vpop.f32.mrf.mxu2 }
 0x2b8   :  { %v2230_v33 = vadd.f32 %v2229_v31, %v2216_v29 }
 0x2d3   :  { %v2241_v27 = vpop.f32.mrf.mxu3 }
 0x2d4   :  { %v2242_v0 = vadd.f32 %v2241_v27, %v2228_v28 }
 0x2d6   :  { %2246 = vst [vmem:[#allocation10] sm:$0xff] %v2242_v0 }
 0x2db   :  { %v2243_v35 = vpop.f32.mrf.mxu3 }
 0x2dc   :  { %v2244_v38 = vadd.f32 %v2243_v35, %v2230_v33 }
 0x2de   :  { %2247 = vst [vmem:[#allocation10 + $0x8] sm:$0xff] %v2244_v38 }
 0x2df   :  { %2260 = dma.vmem_to_hbm [thread:$0]  %s2253_s18, 256, %s2255_s21, [#allocation4], %s3584_s30, %s3584_s30, %s3585_s6  }
 0x2e0   :  { %3578 = dma.done.wait [#allocation4], 256  }
 0x2e1   :  { %3579 = vsyncadd [#allocation4], 4294967040 }
 0x2e2   :  { %2265 = vsyncpa [#allocation3], 1 }
 0x2e3   :  { %2266 = vsyncpa [#allocation6], 1 }
 0x2e4   :  { %2267 = vsyncpa [#allocation9], 1 }
 0x2e5   :  { %2268 = vsyncpa [#allocation4], 1 }

</bundles_post_ra>
